<compile_context>
chip_gen: v7x
topology: tpu7x:2x2x1
jax: 0.10.0
libtpu: 0.0.40
codegen_flags: <defaults>
</compile_context>

<pallas_src>
import functools

import jax
import jax.numpy as jnp
import numpy as np
from jax import lax
from jax.experimental import pallas as pl
from jax.experimental.pallas import tpu as pltpu

_PAD = 128  # lane padding on each side of every image segment in the scratch buffer


def _fused_convs_kernel(x_ref, w1_ref, b1_ref, w2_ref, b2_ref, m_ref,
                        o_ref, pad_ref, tap_ref, *, N, Cin, Cout, H, W, pad):
    """conv2(conv1(x)) for the whole batch, entirely in VMEM, one MXU dot per conv.

    x_ref  : (N*Cin, HW)            flattened NCHW input
    w1_ref : (Cin,  9*Cin)          conv1 tap-matrix weights (col = t*Cin + ci)
    w2_ref : (Cout, 9*Cin)          conv2 tap-matrix weights (only used channels)
    b*_ref : (C, 1)                 biases
    m_ref  : (2, HW)                column-validity masks (row0: dx=-1, row1: dx=+1)
    o_ref  : (N*Cout, HW)           output
    pad_ref: (Cin, N*(HW+2*pad))    zero-haloed per-image segments
    tap_ref: (9*Cin, N*HW)          K-stacked shifted/masked windows
    """
    HW = H * W
    seg = HW + 2 * pad

    # Zero the scratch ONCE (halos must be zero; the image regions are always
    # fully overwritten before every use).
    pad_ref[...] = jnp.zeros_like(pad_ref)

    def load_into_pad(get_image):
        # get_image(n) -> (Cin, HW) f32
        for n in range(N):
            base = n * seg + pad
            pad_ref[:, base:base + HW] = get_image(n)

    def build_tap_matrix():
        # Fill tap_ref with the 9 shifted windows per image, masking columns that
        # wrap across rows for dx = +-1. dy out-of-image rows read the zero halo.
        t = 0
        for dy in (-1, 0, 1):
            for dx in (-1, 0, 1):
                d = dy * W + dx
                for n in range(N):
                    base = n * seg + pad + d
                    win = pad_ref[:, base:base + HW]          # (Cin, HW)
                    if dx == -1:
                        win = win * m_ref[0:1, :]
                    elif dx == 1:
                        win = win * m_ref[1:2, :]
                    tap_ref[t * Cin:(t + 1) * Cin, n * HW:(n + 1) * HW] = win
                t += 1

    def conv(w_ref, b_ref):
        build_tap_matrix()
        # One MXU push: (C_out, 27) x (27, N*HW) -> (C_out, N*HW)
        return jnp.dot(w_ref[...], tap_ref[...],
                       preferred_element_type=jnp.float32) + b_ref[...]

    # conv1
    load_into_pad(lambda n: x_ref[n * Cin:(n + 1) * Cin, :].astype(jnp.float32))
    h = conv(w1_ref, b1_ref)                                   # (Cin, N*HW)

    # conv2 (halos in pad_ref are still zero; only image regions are rewritten)
    load_into_pad(lambda n: h[:, n * HW:(n + 1) * HW])
    y = conv(w2_ref, b2_ref)                                   # (Cout, N*HW)

    for n in range(N):
        o_ref[n * Cout:(n + 1) * Cout, :] = (
            y[:, n * HW:(n + 1) * HW].astype(o_ref.dtype))


def _weights_to_tapmat(w_hwio):
    """(3, 3, Cin, Cout) HWIO -> (Cout, 9*Cin); column = (kh*3 + kw)*Cin + ci."""
    kh, kw, cin, cout = w_hwio.shape
    return jnp.transpose(w_hwio, (3, 0, 1, 2)).reshape(cout, kh * kw * cin)


def _col_masks(H, W):
    """(2, H*W) f32: row0 valid for dx=-1 (w>=1), row1 valid for dx=+1 (w<=W-2)."""
    ww = np.arange(H * W) % W
    left = (ww >= 1).astype(np.float32)
    right = (ww <= W - 2).astype(np.float32)
    return jnp.asarray(np.stack([left, right], axis=0))


def fused_double_conv(x_nchw, w1_hwio, b1, w2_hwio, b2, *, out_dtype=jnp.float32):
    """conv3x3_same(conv3x3_same(x, w1, b1), w2, b2) as one Pallas kernel (NCHW io)."""
    N, Cin, H, W = x_nchw.shape
    HW = H * W
    Cout = w2_hwio.shape[-1]
    assert w1_hwio.shape[-1] == Cin, "scratch reuse assumes conv1 Cout == Cin"
    assert _PAD >= W + 1, "halo must absorb the largest tap shift"

    seg = HW + 2 * _PAD
    x_flat = x_nchw.reshape(N * Cin, HW)            # free row-major reshape
    w1_t = _weights_to_tapmat(w1_hwio)              # (Cin,  9*Cin)
    w2_t = _weights_to_tapmat(w2_hwio)              # (Cout, 9*Cin)
    b1_c = b1.reshape(-1, 1)
    b2_c = b2.reshape(-1, 1)
    masks = _col_masks(H, W)                        # (2, HW), compile-time constant

    kernel = functools.partial(_fused_convs_kernel,
                               N=N, Cin=Cin, Cout=Cout, H=H, W=W, pad=_PAD)
    y_flat = pl.pallas_call(
        kernel,
        out_shape=jax.ShapeDtypeStruct((N * Cout, HW), out_dtype),
        grid=(1,),
        in_specs=[
            pl.BlockSpec((N * Cin, HW), lambda i: (0, 0)),
            pl.BlockSpec(w1_t.shape, lambda i: (0, 0)),
            pl.BlockSpec(b1_c.shape, lambda i: (0, 0)),
            pl.BlockSpec(w2_t.shape, lambda i: (0, 0)),
            pl.BlockSpec(b2_c.shape, lambda i: (0, 0)),
            pl.BlockSpec(masks.shape, lambda i: (0, 0)),
        ],
        out_specs=pl.BlockSpec((N * Cout, HW), lambda i: (0, 0)),
        scratch_shapes=[
            pltpu.VMEM((Cin, N * seg), jnp.float32),      # zero-haloed images
            pltpu.VMEM((9 * Cin, N * HW), jnp.float32),   # K-stacked tap matrix
        ],
        compiler_params=pltpu.CompilerParams(dimension_semantics=("arbitrary",)),
    )(x_flat, w1_t, b1_c, w2_t, b2_c, masks)
    return y_flat.reshape(N, Cout, H, W)


@jax.jit
def model_forward(x_nchw, params):
    """Mirrors Model.forward: v1 = features(x); split [1,1,1] on dim 1; cat; return both."""
    w1, b1, w2, b2 = params
    # TODO(synk): torch.split(v1, [1, 1, 1], dim=1) on a 12-channel tensor raises a
    # RuntimeError in PyTorch; we implement the implied semantics (the first three
    # 1-channel slices). Consequently only channels 0:3 of conv2 are ever needed and
    # the remaining 9 output channels are intentionally never materialized.
    w2_used = w2[..., :3]
    b2_used = b2[:3]
    v1_3 = fused_double_conv(x_nchw, w1, b1, w2_used, b2_used)   # (N, 3, H, W) NCHW
    splits = (v1_3[:, 0:1], v1_3[:, 1:2], v1_3[:, 2:3])
    concatenated = v1_3                                          # cat(splits) == v1_3
    return concatenated, splits


if __name__ == "__main__":
    key = jax.random.PRNGKey(0)
    k1, k2, k3, k4, k5 = jax.random.split(key, 5)

    # Small shapes consistent with the module: Cin must be 3; batch=2, 16x16 spatial.
    x1 = jax.random.normal(k1, (2, 3, 16, 16), jnp.float32)       # NCHW like PyTorch

    # features = Conv2d(3,3,3,1,1) -> Conv2d(3,12,3,1,1); weights kept in HWIO.
    w1 = 0.1 * jax.random.normal(k2, (3, 3, 3, 3), jnp.float32)
    b1 = 0.1 * jax.random.normal(k3, (3,), jnp.float32)
    w2 = 0.1 * jax.random.normal(k4, (3, 3, 3, 12), jnp.float32)
    b2 = 0.1 * jax.random.normal(k5, (12,), jnp.float32)
    # Note: self.split_1 .. self.split_4 in __init__ are unused by forward().

    concatenated, splits = model_forward(x1, (w1, b1, w2, b2))
    jax.block_until_ready((concatenated, splits))

    # Shape checks.
    assert concatenated.shape == (2, 3, 16, 16)
    assert len(splits) == 3 and all(s.shape == (2, 1, 16, 16) for s in splits)

    # Numerical check of the fused Pallas conv path against XLA's conv.
    def ref_conv(x, w, b):
        y = lax.conv_general_dilated(x, w, (1, 1), "SAME",
                                     dimension_numbers=("NCHW", "HWIO", "NCHW"))
        return y + b.reshape(1, -1, 1, 1)

    v1_ref = ref_conv(ref_conv(x1, w1, b1), w2, b2)
    cat_ref = v1_ref[:, 0:3]
    assert jnp.allclose(concatenated, cat_ref, rtol=1e-4, atol=1e-4)
    assert jnp.allclose(jnp.concatenate(splits, axis=1), cat_ref, rtol=1e-4, atol=1e-4)

    print("KERNEL_OK")
</pallas_src>

<mosaic_0001>
module attributes {stable_mosaic.version = 11 : i64} {
  func.func @_fused_convs_kernel(%arg0: i32, %arg1: memref<6x256xf32, #tpu.memory_space<vmem>>, %arg2: memref<3x27xf32, #tpu.memory_space<vmem>>, %arg3: memref<3x1xf32, #tpu.memory_space<vmem>>, %arg4: memref<3x27xf32, #tpu.memory_space<vmem>>, %arg5: memref<3x1xf32, #tpu.memory_space<vmem>>, %arg6: memref<2x256xf32, #tpu.memory_space<vmem>>, %arg7: memref<6x256xf32, #tpu.memory_space<vmem>>, %arg8: memref<3x1024xf32, #tpu.memory_space<vmem>>, %arg9: memref<27x512xf32, #tpu.memory_space<vmem>>) attributes {dimension_semantics = [#tpu.dimension_semantics<arbitrary>], iteration_bounds = array<i64: 1>, scalar_prefetch = 0 : i64, scratch_operands = 2 : i64, tpu.core_type = #tpu.core_type<tc>, window_params = [{pipeline_mode = #tpu.pipeline_mode<synchronous>, transform_indices = @transform_0, window_bounds = array<i64: 6, 256>}, {pipeline_mode = #tpu.pipeline_mode<synchronous>, transform_indices = @transform_1, window_bounds = array<i64: 3, 27>}, {pipeline_mode = #tpu.pipeline_mode<synchronous>, transform_indices = @transform_2, window_bounds = array<i64: 3, 1>}, {pipeline_mode = #tpu.pipeline_mode<synchronous>, transform_indices = @transform_3, window_bounds = array<i64: 3, 27>}, {pipeline_mode = #tpu.pipeline_mode<synchronous>, transform_indices = @transform_4, window_bounds = array<i64: 3, 1>}, {pipeline_mode = #tpu.pipeline_mode<synchronous>, transform_indices = @transform_5, window_bounds = array<i64: 2, 256>}, {pipeline_mode = #tpu.pipeline_mode<synchronous>, transform_indices = @transform_6, window_bounds = array<i64: 6, 256>}]} {
    %cst = arith.constant 0.000000e+00 : f32
    %0 = vector.broadcast %cst : f32 to vector<3x1024xf32>
    %c0 = arith.constant 0 : index
    %c0_0 = arith.constant 0 : index
    %1 = vector.load %arg8[%c0, %c0_0] : memref<3x1024xf32, #tpu.memory_space<vmem>>, vector<3x1024xf32>
    tpu.vector_store %arg8[%c0, %c0_0], %0 {strides = array<i32>} : memref<3x1024xf32, #tpu.memory_space<vmem>>, vector<3x1024xf32>,
    %c0_1 = arith.constant 0 : index
    %c0_2 = arith.constant 0 : index
    %2 = vector.load %arg1[%c0_1, %c0_2] : memref<6x256xf32, #tpu.memory_space<vmem>>, vector<3x256xf32>
    %c0_3 = arith.constant 0 : index
    %c128 = arith.constant 128 : index
    %3 = vector.load %arg8[%c0_3, %c128] : memref<3x1024xf32, #tpu.memory_space<vmem>>, vector<3x256xf32>
    tpu.vector_store %arg8[%c0_3, %c128], %2 {strides = array<i32>} : memref<3x1024xf32, #tpu.memory_space<vmem>>, vector<3x256xf32>,
    %c3 = arith.constant 3 : index
    %c0_4 = arith.constant 0 : index
    %4 = vector.load %arg1[%c3, %c0_4] : memref<6x256xf32, #tpu.memory_space<vmem>>, vector<3x256xf32>
    %c0_5 = arith.constant 0 : index
    %c640 = arith.constant 640 : index
    %5 = vector.load %arg8[%c0_5, %c640] : memref<3x1024xf32, #tpu.memory_space<vmem>>, vector<3x256xf32>
    tpu.vector_store %arg8[%c0_5, %c640], %4 {strides = array<i32>} : memref<3x1024xf32, #tpu.memory_space<vmem>>, vector<3x256xf32>,
    %c0_6 = arith.constant 0 : index
    %c111 = arith.constant 111 : index
    %6 = vector.load %arg8[%c0_6, %c111] : memref<3x1024xf32, #tpu.memory_space<vmem>>, vector<3x256xf32>
    %c0_7 = arith.constant 0 : index
    %c0_8 = arith.constant 0 : index
    %7 = vector.load %arg6[%c0_7, %c0_8] : memref<2x256xf32, #tpu.memory_space<vmem>>, vector<1x256xf32>
    %8 = vector.broadcast %7 : vector<1x256xf32> to vector<3x256xf32>
    %9 = arith.mulf %6, %8 : vector<3x256xf32>
    %c0_9 = arith.constant 0 : index
    %c0_10 = arith.constant 0 : index
    %10 = vector.load %arg9[%c0_9, %c0_10] : memref<27x512xf32, #tpu.memory_space<vmem>>, vector<3x256xf32>
    tpu.vector_store %arg9[%c0_9, %c0_10], %9 {strides = array<i32>} : memref<27x512xf32, #tpu.memory_space<vmem>>, vector<3x256xf32>,
    %c0_11 = arith.constant 0 : index
    %c623 = arith.constant 623 : index
    %11 = vector.load %arg8[%c0_11, %c623] : memref<3x1024xf32, #tpu.memory_space<vmem>>, vector<3x256xf32>
    %c0_12 = arith.constant 0 : index
    %c0_13 = arith.constant 0 : index
    %12 = vector.load %arg6[%c0_12, %c0_13] : memref<2x256xf32, #tpu.memory_space<vmem>>, vector<1x256xf32>
    %13 = vector.broadcast %12 : vector<1x256xf32> to vector<3x256xf32>
    %14 = arith.mulf %11, %13 : vector<3x256xf32>
    %c0_14 = arith.constant 0 : index
    %c256 = arith.constant 256 : index
    %15 = vector.load %arg9[%c0_14, %c256] : memref<27x512xf32, #tpu.memory_space<vmem>>, vector<3x256xf32>
    tpu.vector_store %arg9[%c0_14, %c256], %14 {strides = array<i32>} : memref<27x512xf32, #tpu.memory_space<vmem>>, vector<3x256xf32>,
    %c0_15 = arith.constant 0 : index
    %c112 = arith.constant 112 : index
    %16 = vector.load %arg8[%c0_15, %c112] : memref<3x1024xf32, #tpu.memory_space<vmem>>, vector<3x256xf32>
    %c3_16 = arith.constant 3 : index
    %c0_17 = arith.constant 0 : index
    %17 = vector.load %arg9[%c3_16, %c0_17] : memref<27x512xf32, #tpu.memory_space<vmem>>, vector<3x256xf32>
    tpu.vector_store %arg9[%c3_16, %c0_17], %16 {strides = array<i32>} : memref<27x512xf32, #tpu.memory_space<vmem>>, vector<3x256xf32>,
    %c0_18 = arith.constant 0 : index
    %c624 = arith.constant 624 : index
    %18 = vector.load %arg8[%c0_18, %c624] : memref<3x1024xf32, #tpu.memory_space<vmem>>, vector<3x256xf32>
    %c3_19 = arith.constant 3 : index
    %c256_20 = arith.constant 256 : index
    %19 = vector.load %arg9[%c3_19, %c256_20] : memref<27x512xf32, #tpu.memory_space<vmem>>, vector<3x256xf32>
    tpu.vector_store %arg9[%c3_19, %c256_20], %18 {strides = array<i32>} : memref<27x512xf32, #tpu.memory_space<vmem>>, vector<3x256xf32>,
    %c0_21 = arith.constant 0 : index
    %c113 = arith.constant 113 : index
    %20 = vector.load %arg8[%c0_21, %c113] : memref<3x1024xf32, #tpu.memory_space<vmem>>, vector<3x256xf32>
    %c1 = arith.constant 1 : index
    %c0_22 = arith.constant 0 : index
    %21 = vector.load %arg6[%c1, %c0_22] : memref<2x256xf32, #tpu.memory_space<vmem>>, vector<1x256xf32>
    %22 = vector.broadcast %21 : vector<1x256xf32> to vector<3x256xf32>
    %23 = arith.mulf %20, %22 : vector<3x256xf32>
    %c6 = arith.constant 6 : index
    %c0_23 = arith.constant 0 : index
    %24 = vector.load %arg9[%c6, %c0_23] : memref<27x512xf32, #tpu.memory_space<vmem>>, vector<3x256xf32>
    tpu.vector_store %arg9[%c6, %c0_23], %23 {strides = array<i32>} : memref<27x512xf32, #tpu.memory_space<vmem>>, vector<3x256xf32>,
    %c0_24 = arith.constant 0 : index
    %c625 = arith.constant 625 : index
    %25 = vector.load %arg8[%c0_24, %c625] : memref<3x1024xf32, #tpu.memory_space<vmem>>, vector<3x256xf32>
    %c1_25 = arith.constant 1 : index
    %c0_26 = arith.constant 0 : index
    %26 = vector.load %arg6[%c1_25, %c0_26] : memref<2x256xf32, #tpu.memory_space<vmem>>, vector<1x256xf32>
    %27 = vector.broadcast %26 : vector<1x256xf32> to vector<3x256xf32>
    %28 = arith.mulf %25, %27 : vector<3x256xf32>
    %c6_27 = arith.constant 6 : index
    %c256_28 = arith.constant 256 : index
    %29 = vector.load %arg9[%c6_27, %c256_28] : memref<27x512xf32, #tpu.memory_space<vmem>>, vector<3x256xf32>
    tpu.vector_store %arg9[%c6_27, %c256_28], %28 {strides = array<i32>} : memref<27x512xf32, #tpu.memory_space<vmem>>, vector<3x256xf32>,
    %c0_29 = arith.constant 0 : index
    %c127 = arith.constant 127 : index
    %30 = vector.load %arg8[%c0_29, %c127] : memref<3x1024xf32, #tpu.memory_space<vmem>>, vector<3x256xf32>
    %c0_30 = arith.constant 0 : index
    %c0_31 = arith.constant 0 : index
    %31 = vector.load %arg6[%c0_30, %c0_31] : memref<2x256xf32, #tpu.memory_space<vmem>>, vector<1x256xf32>
    %32 = vector.broadcast %31 : vector<1x256xf32> to vector<3x256xf32>
    %33 = arith.mulf %30, %32 : vector<3x256xf32>
    %c9 = arith.constant 9 : index
    %c0_32 = arith.constant 0 : index
    %34 = vector.load %arg9[%c9, %c0_32] : memref<27x512xf32, #tpu.memory_space<vmem>>, vector<3x256xf32>
    tpu.vector_store %arg9[%c9, %c0_32], %33 {strides = array<i32>} : memref<27x512xf32, #tpu.memory_space<vmem>>, vector<3x256xf32>,
    %c0_33 = arith.constant 0 : index
    %c639 = arith.constant 639 : index
    %35 = vector.load %arg8[%c0_33, %c639] : memref<3x1024xf32, #tpu.memory_space<vmem>>, vector<3x256xf32>
    %c0_34 = arith.constant 0 : index
    %c0_35 = arith.constant 0 : index
    %36 = vector.load %arg6[%c0_34, %c0_35] : memref<2x256xf32, #tpu.memory_space<vmem>>, vector<1x256xf32>
    %37 = vector.broadcast %36 : vector<1x256xf32> to vector<3x256xf32>
    %38 = arith.mulf %35, %37 : vector<3x256xf32>
    %c9_36 = arith.constant 9 : index
    %c256_37 = arith.constant 256 : index
    %39 = vector.load %arg9[%c9_36, %c256_37] : memref<27x512xf32, #tpu.memory_space<vmem>>, vector<3x256xf32>
    tpu.vector_store %arg9[%c9_36, %c256_37], %38 {strides = array<i32>} : memref<27x512xf32, #tpu.memory_space<vmem>>, vector<3x256xf32>,
    %c0_38 = arith.constant 0 : index
    %c128_39 = arith.constant 128 : index
    %40 = vector.load %arg8[%c0_38, %c128_39] : memref<3x1024xf32, #tpu.memory_space<vmem>>, vector<3x256xf32>
    %c12 = arith.constant 12 : index
    %c0_40 = arith.constant 0 : index
    %41 = vector.load %arg9[%c12, %c0_40] : memref<27x512xf32, #tpu.memory_space<vmem>>, vector<3x256xf32>
    tpu.vector_store %arg9[%c12, %c0_40], %40 {strides = array<i32>} : memref<27x512xf32, #tpu.memory_space<vmem>>, vector<3x256xf32>,
    %c0_41 = arith.constant 0 : index
    %c640_42 = arith.constant 640 : index
    %42 = vector.load %arg8[%c0_41, %c640_42] : memref<3x1024xf32, #tpu.memory_space<vmem>>, vector<3x256xf32>
    %c12_43 = arith.constant 12 : index
    %c256_44 = arith.constant 256 : index
    %43 = vector.load %arg9[%c12_43, %c256_44] : memref<27x512xf32, #tpu.memory_space<vmem>>, vector<3x256xf32>
    tpu.vector_store %arg9[%c12_43, %c256_44], %42 {strides = array<i32>} : memref<27x512xf32, #tpu.memory_space<vmem>>, vector<3x256xf32>,
    %c0_45 = arith.constant 0 : index
    %c129 = arith.constant 129 : index
    %44 = vector.load %arg8[%c0_45, %c129] : memref<3x1024xf32, #tpu.memory_space<vmem>>, vector<3x256xf32>
    %c1_46 = arith.constant 1 : index
    %c0_47 = arith.constant 0 : index
    %45 = vector.load %arg6[%c1_46, %c0_47] : memref<2x256xf32, #tpu.memory_space<vmem>>, vector<1x256xf32>
    %46 = vector.broadcast %45 : vector<1x256xf32> to vector<3x256xf32>
    %47 = arith.mulf %44, %46 : vector<3x256xf32>
    %c15 = arith.constant 15 : index
    %c0_48 = arith.constant 0 : index
    %48 = vector.load %arg9[%c15, %c0_48] : memref<27x512xf32, #tpu.memory_space<vmem>>, vector<3x256xf32>
    tpu.vector_store %arg9[%c15, %c0_48], %47 {strides = array<i32>} : memref<27x512xf32, #tpu.memory_space<vmem>>, vector<3x256xf32>,
    %c0_49 = arith.constant 0 : index
    %c641 = arith.constant 641 : index
    %49 = vector.load %arg8[%c0_49, %c641] : memref<3x1024xf32, #tpu.memory_space<vmem>>, vector<3x256xf32>
    %c1_50 = arith.constant 1 : index
    %c0_51 = arith.constant 0 : index
    %50 = vector.load %arg6[%c1_50, %c0_51] : memref<2x256xf32, #tpu.memory_space<vmem>>, vector<1x256xf32>
    %51 = vector.broadcast %50 : vector<1x256xf32> to vector<3x256xf32>
    %52 = arith.mulf %49, %51 : vector<3x256xf32>
    %c15_52 = arith.constant 15 : index
    %c256_53 = arith.constant 256 : index
    %53 = vector.load %arg9[%c15_52, %c256_53] : memref<27x512xf32, #tpu.memory_space<vmem>>, vector<3x256xf32>
    tpu.vector_store %arg9[%c15_52, %c256_53], %52 {strides = array<i32>} : memref<27x512xf32, #tpu.memory_space<vmem>>, vector<3x256xf32>,
    %c0_54 = arith.constant 0 : index
    %c143 = arith.constant 143 : index
    %54 = vector.load %arg8[%c0_54, %c143] : memref<3x1024xf32, #tpu.memory_space<vmem>>, vector<3x256xf32>
    %c0_55 = arith.constant 0 : index
    %c0_56 = arith.constant 0 : index
    %55 = vector.load %arg6[%c0_55, %c0_56] : memref<2x256xf32, #tpu.memory_space<vmem>>, vector<1x256xf32>
    %56 = vector.broadcast %55 : vector<1x256xf32> to vector<3x256xf32>
    %57 = arith.mulf %54, %56 : vector<3x256xf32>
    %c18 = arith.constant 18 : index
    %c0_57 = arith.constant 0 : index
    %58 = vector.load %arg9[%c18, %c0_57] : memref<27x512xf32, #tpu.memory_space<vmem>>, vector<3x256xf32>
    tpu.vector_store %arg9[%c18, %c0_57], %57 {strides = array<i32>} : memref<27x512xf32, #tpu.memory_space<vmem>>, vector<3x256xf32>,
    %c0_58 = arith.constant 0 : index
    %c655 = arith.constant 655 : index
    %59 = vector.load %arg8[%c0_58, %c655] : memref<3x1024xf32, #tpu.memory_space<vmem>>, vector<3x256xf32>
    %c0_59 = arith.constant 0 : index
    %c0_60 = arith.constant 0 : index
    %60 = vector.load %arg6[%c0_59, %c0_60] : memref<2x256xf32, #tpu.memory_space<vmem>>, vector<1x256xf32>
    %61 = vector.broadcast %60 : vector<1x256xf32> to vector<3x256xf32>
    %62 = arith.mulf %59, %61 : vector<3x256xf32>
    %c18_61 = arith.constant 18 : index
    %c256_62 = arith.constant 256 : index
    %63 = vector.load %arg9[%c18_61, %c256_62] : memref<27x512xf32, #tpu.memory_space<vmem>>, vector<3x256xf32>
    tpu.vector_store %arg9[%c18_61, %c256_62], %62 {strides = array<i32>} : memref<27x512xf32, #tpu.memory_space<vmem>>, vector<3x256xf32>,
    %c0_63 = arith.constant 0 : index
    %c144 = arith.constant 144 : index
    %64 = vector.load %arg8[%c0_63, %c144] : memref<3x1024xf32, #tpu.memory_space<vmem>>, vector<3x256xf32>
    %c21 = arith.constant 21 : index
    %c0_64 = arith.constant 0 : index
    %65 = vector.load %arg9[%c21, %c0_64] : memref<27x512xf32, #tpu.memory_space<vmem>>, vector<3x256xf32>
    tpu.vector_store %arg9[%c21, %c0_64], %64 {strides = array<i32>} : memref<27x512xf32, #tpu.memory_space<vmem>>, vector<3x256xf32>,
    %c0_65 = arith.constant 0 : index
    %c656 = arith.constant 656 : index
    %66 = vector.load %arg8[%c0_65, %c656] : memref<3x1024xf32, #tpu.memory_space<vmem>>, vector<3x256xf32>
    %c21_66 = arith.constant 21 : index
    %c256_67 = arith.constant 256 : index
    %67 = vector.load %arg9[%c21_66, %c256_67] : memref<27x512xf32, #tpu.memory_space<vmem>>, vector<3x256xf32>
    tpu.vector_store %arg9[%c21_66, %c256_67], %66 {strides = array<i32>} : memref<27x512xf32, #tpu.memory_space<vmem>>, vector<3x256xf32>,
    %c0_68 = arith.constant 0 : index
    %c145 = arith.constant 145 : index
    %68 = vector.load %arg8[%c0_68, %c145] : memref<3x1024xf32, #tpu.memory_space<vmem>>, vector<3x256xf32>
    %c1_69 = arith.constant 1 : index
    %c0_70 = arith.constant 0 : index
    %69 = vector.load %arg6[%c1_69, %c0_70] : memref<2x256xf32, #tpu.memory_space<vmem>>, vector<1x256xf32>
    %70 = vector.broadcast %69 : vector<1x256xf32> to vector<3x256xf32>
    %71 = arith.mulf %68, %70 : vector<3x256xf32>
    %c24 = arith.constant 24 : index
    %c0_71 = arith.constant 0 : index
    %72 = vector.load %arg9[%c24, %c0_71] : memref<27x512xf32, #tpu.memory_space<vmem>>, vector<3x256xf32>
    tpu.vector_store %arg9[%c24, %c0_71], %71 {strides = array<i32>} : memref<27x512xf32, #tpu.memory_space<vmem>>, vector<3x256xf32>,
    %c0_72 = arith.constant 0 : index
    %c657 = arith.constant 657 : index
    %73 = vector.load %arg8[%c0_72, %c657] : memref<3x1024xf32, #tpu.memory_space<vmem>>, vector<3x256xf32>
    %c1_73 = arith.constant 1 : index
    %c0_74 = arith.constant 0 : index
    %74 = vector.load %arg6[%c1_73, %c0_74] : memref<2x256xf32, #tpu.memory_space<vmem>>, vector<1x256xf32>
    %75 = vector.broadcast %74 : vector<1x256xf32> to vector<3x256xf32>
    %76 = arith.mulf %73, %75 : vector<3x256xf32>
    %c24_75 = arith.constant 24 : index
    %c256_76 = arith.constant 256 : index
    %77 = vector.load %arg9[%c24_75, %c256_76] : memref<27x512xf32, #tpu.memory_space<vmem>>, vector<3x256xf32>
    tpu.vector_store %arg9[%c24_75, %c256_76], %76 {strides = array<i32>} : memref<27x512xf32, #tpu.memory_space<vmem>>, vector<3x256xf32>,
    %c0_77 = arith.constant 0 : index
    %c0_78 = arith.constant 0 : index
    %78 = vector.load %arg2[%c0_77, %c0_78] : memref<3x27xf32, #tpu.memory_space<vmem>>, vector<3x27xf32>
    %c0_79 = arith.constant 0 : index
    %c0_80 = arith.constant 0 : index
    %79 = vector.load %arg9[%c0_79, %c0_80] : memref<27x512xf32, #tpu.memory_space<vmem>>, vector<27x512xf32>
    %cst_81 = arith.constant dense<0.000000e+00> : vector<3x512xf32>
    %80 = tpu.matmul %78, %79, %cst_81 {dimension_numbers = #tpu.dot_dimension_numbers<[1], [0], [0], [1], [0, 0, 1, 1], [], []>} : vector<3x27xf32>, vector<27x512xf32>, vector<3x512xf32> -> vector<3x512xf32>
    %c0_82 = arith.constant 0 : index
    %c0_83 = arith.constant 0 : index
    %81 = vector.load %arg3[%c0_82, %c0_83] : memref<3x1xf32, #tpu.memory_space<vmem>>, vector<3x1xf32>
    %82 = vector.broadcast %81 : vector<3x1xf32> to vector<3x512xf32>
    %83 = arith.addf %80, %82 : vector<3x512xf32>
    %84 = vector.extract_strided_slice %83 {offsets = [0, 0], sizes = [3, 256], strides = [1, 1]} : vector<3x512xf32> to vector<3x256xf32>
    %c0_84 = arith.constant 0 : index
    %c128_85 = arith.constant 128 : index
    %85 = vector.load %arg8[%c0_84, %c128_85] : memref<3x1024xf32, #tpu.memory_space<vmem>>, vector<3x256xf32>
    tpu.vector_store %arg8[%c0_84, %c128_85], %84 {strides = array<i32>} : memref<3x1024xf32, #tpu.memory_space<vmem>>, vector<3x256xf32>,
    %86 = vector.extract_strided_slice %83 {offsets = [0, 256], sizes = [3, 256], strides = [1, 1]} : vector<3x512xf32> to vector<3x256xf32>
    %c0_86 = arith.constant 0 : index
    %c640_87 = arith.constant 640 : index
    %87 = vector.load %arg8[%c0_86, %c640_87] : memref<3x1024xf32, #tpu.memory_space<vmem>>, vector<3x256xf32>
    tpu.vector_store %arg8[%c0_86, %c640_87], %86 {strides = array<i32>} : memref<3x1024xf32, #tpu.memory_space<vmem>>, vector<3x256xf32>,
    %c0_88 = arith.constant 0 : index
    %c111_89 = arith.constant 111 : index
    %88 = vector.load %arg8[%c0_88, %c111_89] : memref<3x1024xf32, #tpu.memory_space<vmem>>, vector<3x256xf32>
    %c0_90 = arith.constant 0 : index
    %c0_91 = arith.constant 0 : index
    %89 = vector.load %arg6[%c0_90, %c0_91] : memref<2x256xf32, #tpu.memory_space<vmem>>, vector<1x256xf32>
    %90 = vector.broadcast %89 : vector<1x256xf32> to vector<3x256xf32>
    %91 = arith.mulf %88, %90 : vector<3x256xf32>
    %c0_92 = arith.constant 0 : index
    %c0_93 = arith.constant 0 : index
    %92 = vector.load %arg9[%c0_92, %c0_93] : memref<27x512xf32, #tpu.memory_space<vmem>>, vector<3x256xf32>
    tpu.vector_store %arg9[%c0_92, %c0_93], %91 {strides = array<i32>} : memref<27x512xf32, #tpu.memory_space<vmem>>, vector<3x256xf32>,
    %c0_94 = arith.constant 0 : index
    %c623_95 = arith.constant 623 : index
    %93 = vector.load %arg8[%c0_94, %c623_95] : memref<3x1024xf32, #tpu.memory_space<vmem>>, vector<3x256xf32>
    %c0_96 = arith.constant 0 : index
    %c0_97 = arith.constant 0 : index
    %94 = vector.load %arg6[%c0_96, %c0_97] : memref<2x256xf32, #tpu.memory_space<vmem>>, vector<1x256xf32>
    %95 = vector.broadcast %94 : vector<1x256xf32> to vector<3x256xf32>
    %96 = arith.mulf %93, %95 : vector<3x256xf32>
    %c0_98 = arith.constant 0 : index
    %c256_99 = arith.constant 256 : index
    %97 = vector.load %arg9[%c0_98, %c256_99] : memref<27x512xf32, #tpu.memory_space<vmem>>, vector<3x256xf32>
    tpu.vector_store %arg9[%c0_98, %c256_99], %96 {strides = array<i32>} : memref<27x512xf32, #tpu.memory_space<vmem>>, vector<3x256xf32>,
    %c0_100 = arith.constant 0 : index
    %c112_101 = arith.constant 112 : index
    %98 = vector.load %arg8[%c0_100, %c112_101] : memref<3x1024xf32, #tpu.memory_space<vmem>>, vector<3x256xf32>
    %c3_102 = arith.constant 3 : index
    %c0_103 = arith.constant 0 : index
    %99 = vector.load %arg9[%c3_102, %c0_103] : memref<27x512xf32, #tpu.memory_space<vmem>>, vector<3x256xf32>
    tpu.vector_store %arg9[%c3_102, %c0_103], %98 {strides = array<i32>} : memref<27x512xf32, #tpu.memory_space<vmem>>, vector<3x256xf32>,
    %c0_104 = arith.constant 0 : index
    %c624_105 = arith.constant 624 : index
    %100 = vector.load %arg8[%c0_104, %c624_105] : memref<3x1024xf32, #tpu.memory_space<vmem>>, vector<3x256xf32>
    %c3_106 = arith.constant 3 : index
    %c256_107 = arith.constant 256 : index
    %101 = vector.load %arg9[%c3_106, %c256_107] : memref<27x512xf32, #tpu.memory_space<vmem>>, vector<3x256xf32>
    tpu.vector_store %arg9[%c3_106, %c256_107], %100 {strides = array<i32>} : memref<27x512xf32, #tpu.memory_space<vmem>>, vector<3x256xf32>,
    %c0_108 = arith.constant 0 : index
    %c113_109 = arith.constant 113 : index
    %102 = vector.load %arg8[%c0_108, %c113_109] : memref<3x1024xf32, #tpu.memory_space<vmem>>, vector<3x256xf32>
    %c1_110 = arith.constant 1 : index
    %c0_111 = arith.constant 0 : index
    %103 = vector.load %arg6[%c1_110, %c0_111] : memref<2x256xf32, #tpu.memory_space<vmem>>, vector<1x256xf32>
    %104 = vector.broadcast %103 : vector<1x256xf32> to vector<3x256xf32>
    %105 = arith.mulf %102, %104 : vector<3x256xf32>
    %c6_112 = arith.constant 6 : index
    %c0_113 = arith.constant 0 : index
    %106 = vector.load %arg9[%c6_112, %c0_113] : memref<27x512xf32, #tpu.memory_space<vmem>>, vector<3x256xf32>
    tpu.vector_store %arg9[%c6_112, %c0_113], %105 {strides = array<i32>} : memref<27x512xf32, #tpu.memory_space<vmem>>, vector<3x256xf32>,
    %c0_114 = arith.constant 0 : index
    %c625_115 = arith.constant 625 : index
    %107 = vector.load %arg8[%c0_114, %c625_115] : memref<3x1024xf32, #tpu.memory_space<vmem>>, vector<3x256xf32>
    %c1_116 = arith.constant 1 : index
    %c0_117 = arith.constant 0 : index
    %108 = vector.load %arg6[%c1_116, %c0_117] : memref<2x256xf32, #tpu.memory_space<vmem>>, vector<1x256xf32>
    %109 = vector.broadcast %108 : vector<1x256xf32> to vector<3x256xf32>
    %110 = arith.mulf %107, %109 : vector<3x256xf32>
    %c6_118 = arith.constant 6 : index
    %c256_119 = arith.constant 256 : index
    %111 = vector.load %arg9[%c6_118, %c256_119] : memref<27x512xf32, #tpu.memory_space<vmem>>, vector<3x256xf32>
    tpu.vector_store %arg9[%c6_118, %c256_119], %110 {strides = array<i32>} : memref<27x512xf32, #tpu.memory_space<vmem>>, vector<3x256xf32>,
    %c0_120 = arith.constant 0 : index
    %c127_121 = arith.constant 127 : index
    %112 = vector.load %arg8[%c0_120, %c127_121] : memref<3x1024xf32, #tpu.memory_space<vmem>>, vector<3x256xf32>
    %c0_122 = arith.constant 0 : index
    %c0_123 = arith.constant 0 : index
    %113 = vector.load %arg6[%c0_122, %c0_123] : memref<2x256xf32, #tpu.memory_space<vmem>>, vector<1x256xf32>
    %114 = vector.broadcast %113 : vector<1x256xf32> to vector<3x256xf32>
    %115 = arith.mulf %112, %114 : vector<3x256xf32>
    %c9_124 = arith.constant 9 : index
    %c0_125 = arith.constant 0 : index
    %116 = vector.load %arg9[%c9_124, %c0_125] : memref<27x512xf32, #tpu.memory_space<vmem>>, vector<3x256xf32>
    tpu.vector_store %arg9[%c9_124, %c0_125], %115 {strides = array<i32>} : memref<27x512xf32, #tpu.memory_space<vmem>>, vector<3x256xf32>,
    %c0_126 = arith.constant 0 : index
    %c639_127 = arith.constant 639 : index
    %117 = vector.load %arg8[%c0_126, %c639_127] : memref<3x1024xf32, #tpu.memory_space<vmem>>, vector<3x256xf32>
    %c0_128 = arith.constant 0 : index
    %c0_129 = arith.constant 0 : index
    %118 = vector.load %arg6[%c0_128, %c0_129] : memref<2x256xf32, #tpu.memory_space<vmem>>, vector<1x256xf32>
    %119 = vector.broadcast %118 : vector<1x256xf32> to vector<3x256xf32>
    %120 = arith.mulf %117, %119 : vector<3x256xf32>
    %c9_130 = arith.constant 9 : index
    %c256_131 = arith.constant 256 : index
    %121 = vector.load %arg9[%c9_130, %c256_131] : memref<27x512xf32, #tpu.memory_space<vmem>>, vector<3x256xf32>
    tpu.vector_store %arg9[%c9_130, %c256_131], %120 {strides = array<i32>} : memref<27x512xf32, #tpu.memory_space<vmem>>, vector<3x256xf32>,
    %c0_132 = arith.constant 0 : index
    %c128_133 = arith.constant 128 : index
    %122 = vector.load %arg8[%c0_132, %c128_133] : memref<3x1024xf32, #tpu.memory_space<vmem>>, vector<3x256xf32>
    %c12_134 = arith.constant 12 : index
    %c0_135 = arith.constant 0 : index
    %123 = vector.load %arg9[%c12_134, %c0_135] : memref<27x512xf32, #tpu.memory_space<vmem>>, vector<3x256xf32>
    tpu.vector_store %arg9[%c12_134, %c0_135], %122 {strides = array<i32>} : memref<27x512xf32, #tpu.memory_space<vmem>>, vector<3x256xf32>,
    %c0_136 = arith.constant 0 : index
    %c640_137 = arith.constant 640 : index
    %124 = vector.load %arg8[%c0_136, %c640_137] : memref<3x1024xf32, #tpu.memory_space<vmem>>, vector<3x256xf32>
    %c12_138 = arith.constant 12 : index
    %c256_139 = arith.constant 256 : index
    %125 = vector.load %arg9[%c12_138, %c256_139] : memref<27x512xf32, #tpu.memory_space<vmem>>, vector<3x256xf32>
    tpu.vector_store %arg9[%c12_138, %c256_139], %124 {strides = array<i32>} : memref<27x512xf32, #tpu.memory_space<vmem>>, vector<3x256xf32>,
    %c0_140 = arith.constant 0 : index
    %c129_141 = arith.constant 129 : index
    %126 = vector.load %arg8[%c0_140, %c129_141] : memref<3x1024xf32, #tpu.memory_space<vmem>>, vector<3x256xf32>
    %c1_142 = arith.constant 1 : index
    %c0_143 = arith.constant 0 : index
    %127 = vector.load %arg6[%c1_142, %c0_143] : memref<2x256xf32, #tpu.memory_space<vmem>>, vector<1x256xf32>
    %128 = vector.broadcast %127 : vector<1x256xf32> to vector<3x256xf32>
    %129 = arith.mulf %126, %128 : vector<3x256xf32>
    %c15_144 = arith.constant 15 : index
    %c0_145 = arith.constant 0 : index
    %130 = vector.load %arg9[%c15_144, %c0_145] : memref<27x512xf32, #tpu.memory_space<vmem>>, vector<3x256xf32>
    tpu.vector_store %arg9[%c15_144, %c0_145], %129 {strides = array<i32>} : memref<27x512xf32, #tpu.memory_space<vmem>>, vector<3x256xf32>,
    %c0_146 = arith.constant 0 : index
    %c641_147 = arith.constant 641 : index
    %131 = vector.load %arg8[%c0_146, %c641_147] : memref<3x1024xf32, #tpu.memory_space<vmem>>, vector<3x256xf32>
    %c1_148 = arith.constant 1 : index
    %c0_149 = arith.constant 0 : index
    %132 = vector.load %arg6[%c1_148, %c0_149] : memref<2x256xf32, #tpu.memory_space<vmem>>, vector<1x256xf32>
    %133 = vector.broadcast %132 : vector<1x256xf32> to vector<3x256xf32>
    %134 = arith.mulf %131, %133 : vector<3x256xf32>
    %c15_150 = arith.constant 15 : index
    %c256_151 = arith.constant 256 : index
    %135 = vector.load %arg9[%c15_150, %c256_151] : memref<27x512xf32, #tpu.memory_space<vmem>>, vector<3x256xf32>
    tpu.vector_store %arg9[%c15_150, %c256_151], %134 {strides = array<i32>} : memref<27x512xf32, #tpu.memory_space<vmem>>, vector<3x256xf32>,
    %c0_152 = arith.constant 0 : index
    %c143_153 = arith.constant 143 : index
    %136 = vector.load %arg8[%c0_152, %c143_153] : memref<3x1024xf32, #tpu.memory_space<vmem>>, vector<3x256xf32>
    %c0_154 = arith.constant 0 : index
    %c0_155 = arith.constant 0 : index
    %137 = vector.load %arg6[%c0_154, %c0_155] : memref<2x256xf32, #tpu.memory_space<vmem>>, vector<1x256xf32>
    %138 = vector.broadcast %137 : vector<1x256xf32> to vector<3x256xf32>
    %139 = arith.mulf %136, %138 : vector<3x256xf32>
    %c18_156 = arith.constant 18 : index
    %c0_157 = arith.constant 0 : index
    %140 = vector.load %arg9[%c18_156, %c0_157] : memref<27x512xf32, #tpu.memory_space<vmem>>, vector<3x256xf32>
    tpu.vector_store %arg9[%c18_156, %c0_157], %139 {strides = array<i32>} : memref<27x512xf32, #tpu.memory_space<vmem>>, vector<3x256xf32>,
    %c0_158 = arith.constant 0 : index
    %c655_159 = arith.constant 655 : index
    %141 = vector.load %arg8[%c0_158, %c655_159] : memref<3x1024xf32, #tpu.memory_space<vmem>>, vector<3x256xf32>
    %c0_160 = arith.constant 0 : index
    %c0_161 = arith.constant 0 : index
    %142 = vector.load %arg6[%c0_160, %c0_161] : memref<2x256xf32, #tpu.memory_space<vmem>>, vector<1x256xf32>
    %143 = vector.broadcast %142 : vector<1x256xf32> to vector<3x256xf32>
    %144 = arith.mulf %141, %143 : vector<3x256xf32>
    %c18_162 = arith.constant 18 : index
    %c256_163 = arith.constant 256 : index
    %145 = vector.load %arg9[%c18_162, %c256_163] : memref<27x512xf32, #tpu.memory_space<vmem>>, vector<3x256xf32>
    tpu.vector_store %arg9[%c18_162, %c256_163], %144 {strides = array<i32>} : memref<27x512xf32, #tpu.memory_space<vmem>>, vector<3x256xf32>,
    %c0_164 = arith.constant 0 : index
    %c144_165 = arith.constant 144 : index
    %146 = vector.load %arg8[%c0_164, %c144_165] : memref<3x1024xf32, #tpu.memory_space<vmem>>, vector<3x256xf32>
    %c21_166 = arith.constant 21 : index
    %c0_167 = arith.constant 0 : index
    %147 = vector.load %arg9[%c21_166, %c0_167] : memref<27x512xf32, #tpu.memory_space<vmem>>, vector<3x256xf32>
    tpu.vector_store %arg9[%c21_166, %c0_167], %146 {strides = array<i32>} : memref<27x512xf32, #tpu.memory_space<vmem>>, vector<3x256xf32>,
    %c0_168 = arith.constant 0 : index
    %c656_169 = arith.constant 656 : index
    %148 = vector.load %arg8[%c0_168, %c656_169] : memref<3x1024xf32, #tpu.memory_space<vmem>>, vector<3x256xf32>
    %c21_170 = arith.constant 21 : index
    %c256_171 = arith.constant 256 : index
    %149 = vector.load %arg9[%c21_170, %c256_171] : memref<27x512xf32, #tpu.memory_space<vmem>>, vector<3x256xf32>
    tpu.vector_store %arg9[%c21_170, %c256_171], %148 {strides = array<i32>} : memref<27x512xf32, #tpu.memory_space<vmem>>, vector<3x256xf32>,
    %c0_172 = arith.constant 0 : index
    %c145_173 = arith.constant 145 : index
    %150 = vector.load %arg8[%c0_172, %c145_173] : memref<3x1024xf32, #tpu.memory_space<vmem>>, vector<3x256xf32>
    %c1_174 = arith.constant 1 : index
    %c0_175 = arith.constant 0 : index
    %151 = vector.load %arg6[%c1_174, %c0_175] : memref<2x256xf32, #tpu.memory_space<vmem>>, vector<1x256xf32>
    %152 = vector.broadcast %151 : vector<1x256xf32> to vector<3x256xf32>
    %153 = arith.mulf %150, %152 : vector<3x256xf32>
    %c24_176 = arith.constant 24 : index
    %c0_177 = arith.constant 0 : index
    %154 = vector.load %arg9[%c24_176, %c0_177] : memref<27x512xf32, #tpu.memory_space<vmem>>, vector<3x256xf32>
    tpu.vector_store %arg9[%c24_176, %c0_177], %153 {strides = array<i32>} : memref<27x512xf32, #tpu.memory_space<vmem>>, vector<3x256xf32>,
    %c0_178 = arith.constant 0 : index
    %c657_179 = arith.constant 657 : index
    %155 = vector.load %arg8[%c0_178, %c657_179] : memref<3x1024xf32, #tpu.memory_space<vmem>>, vector<3x256xf32>
    %c1_180 = arith.constant 1 : index
    %c0_181 = arith.constant 0 : index
    %156 = vector.load %arg6[%c1_180, %c0_181] : memref<2x256xf32, #tpu.memory_space<vmem>>, vector<1x256xf32>
    %157 = vector.broadcast %156 : vector<1x256xf32> to vector<3x256xf32>
    %158 = arith.mulf %155, %157 : vector<3x256xf32>
    %c24_182 = arith.constant 24 : index
    %c256_183 = arith.constant 256 : index
    %159 = vector.load %arg9[%c24_182, %c256_183] : memref<27x512xf32, #tpu.memory_space<vmem>>, vector<3x256xf32>
    tpu.vector_store %arg9[%c24_182, %c256_183], %158 {strides = array<i32>} : memref<27x512xf32, #tpu.memory_space<vmem>>, vector<3x256xf32>,
    %c0_184 = arith.constant 0 : index
    %c0_185 = arith.constant 0 : index
    %160 = vector.load %arg4[%c0_184, %c0_185] : memref<3x27xf32, #tpu.memory_space<vmem>>, vector<3x27xf32>
    %c0_186 = arith.constant 0 : index
    %c0_187 = arith.constant 0 : index
    %161 = vector.load %arg9[%c0_186, %c0_187] : memref<27x512xf32, #tpu.memory_space<vmem>>, vector<27x512xf32>
    %cst_188 = arith.constant dense<0.000000e+00> : vector<3x512xf32>
    %162 = tpu.matmul %160, %161, %cst_188 {dimension_numbers = #tpu.dot_dimension_numbers<[1], [0], [0], [1], [0, 0, 1, 1], [], []>} : vector<3x27xf32>, vector<27x512xf32>, vector<3x512xf32> -> vector<3x512xf32>
    %c0_189 = arith.constant 0 : index
    %c0_190 = arith.constant 0 : index
    %163 = vector.load %arg5[%c0_189, %c0_190] : memref<3x1xf32, #tpu.memory_space<vmem>>, vector<3x1xf32>
    %164 = vector.broadcast %163 : vector<3x1xf32> to vector<3x512xf32>
    %165 = arith.addf %162, %164 : vector<3x512xf32>
    %166 = vector.extract_strided_slice %165 {offsets = [0, 0], sizes = [3, 256], strides = [1, 1]} : vector<3x512xf32> to vector<3x256xf32>
    %c0_191 = arith.constant 0 : index
    %c0_192 = arith.constant 0 : index
    %167 = vector.load %arg7[%c0_191, %c0_192] : memref<6x256xf32, #tpu.memory_space<vmem>>, vector<3x256xf32>
    tpu.vector_store %arg7[%c0_191, %c0_192], %166 {strides = array<i32>} : memref<6x256xf32, #tpu.memory_space<vmem>>, vector<3x256xf32>,
    %168 = vector.extract_strided_slice %165 {offsets = [0, 256], sizes = [3, 256], strides = [1, 1]} : vector<3x512xf32> to vector<3x256xf32>
    %c3_193 = arith.constant 3 : index
    %c0_194 = arith.constant 0 : index
    %169 = vector.load %arg7[%c3_193, %c0_194] : memref<6x256xf32, #tpu.memory_space<vmem>>, vector<3x256xf32>
    tpu.vector_store %arg7[%c3_193, %c0_194], %168 {strides = array<i32>} : memref<6x256xf32, #tpu.memory_space<vmem>>, vector<3x256xf32>,
    return
  }
  func.func @transform_0(%arg0: i32) -> (i32, i32) {
    %c0_i32 = arith.constant 0 : i32
    %c0_i32_0 = arith.constant 0 : i32
    %c0_i32_1 = arith.constant 0 : i32
    return %c0_i32, %c0_i32_0 : i32, i32
  }
  func.func @transform_1(%arg0: i32) -> (i32, i32) {
    %c0_i32 = arith.constant 0 : i32
    %c0_i32_0 = arith.constant 0 : i32
    %c0_i32_1 = arith.constant 0 : i32
    return %c0_i32, %c0_i32_0 : i32, i32
  }
  func.func @transform_2(%arg0: i32) -> (i32, i32) {
    %c0_i32 = arith.constant 0 : i32
    %c0_i32_0 = arith.constant 0 : i32
    %c0_i32_1 = arith.constant 0 : i32
    return %c0_i32, %c0_i32_0 : i32, i32
  }
  func.func @transform_3(%arg0: i32) -> (i32, i32) {
    %c0_i32 = arith.constant 0 : i32
    %c0_i32_0 = arith.constant 0 : i32
    %c0_i32_1 = arith.constant 0 : i32
    return %c0_i32, %c0_i32_0 : i32, i32
  }
  func.func @transform_4(%arg0: i32) -> (i32, i32) {
    %c0_i32 = arith.constant 0 : i32
    %c0_i32_0 = arith.constant 0 : i32
    %c0_i32_1 = arith.constant 0 : i32
    return %c0_i32, %c0_i32_0 : i32, i32
  }
  func.func @transform_5(%arg0: i32) -> (i32, i32) {
    %c0_i32 = arith.constant 0 : i32
    %c0_i32_0 = arith.constant 0 : i32
    %c0_i32_1 = arith.constant 0 : i32
    return %c0_i32, %c0_i32_0 : i32, i32
  }
  func.func @transform_6(%arg0: i32) -> (i32, i32) {
    %c0_i32 = arith.constant 0 : i32
    %c0_i32_0 = arith.constant 0 : i32
    %c0_i32_1 = arith.constant 0 : i32
    return %c0_i32, %c0_i32_0 : i32, i32
  }
}

</mosaic_0001>

<bundles_post_ra>
// kernel: model_forward.1
= control target key start
LH: loop header
LB: loop body
LE: loop exit
PB: predicated region body
PF: predicated region fallthrough
CT: control target
= control target key end

     0   :  { %v53_v0 = vlaneseq  ;;  %v1660_v1 = vmov 0.0   ;;  %vm40_vm0 = vcmask 1040384   ;;  %vm41_vm1 = vcmask 1044484   ;;  %s1661_s15 = smov 1   ;;  %s1662_s16 = smov 113   ;;  %s2310_s5 = inlined_call_operand.vmem [shape: f32[2,256], index: 5, kind: input, shape index: {}]   ;;  %s2311_s0 = inlined_call_operand.vmem [shape: f32[6,256], index: 0, kind: input, shape index: {}]   ;;  %s2312_s2 = inlined_call_operand.vmem [shape: f32[3,1], index: 2, kind: input, shape index: {}]   ;;  %s2313_s1 = inlined_call_operand.vmem [shape: f32[3,27], index: 1, kind: input, shape index: {}]   ;;  %s2314_s4 = inlined_call_operand.vmem [shape: f32[3,1], index: 4, kind: input, shape index: {}]   ;;  %s2315_s3 = inlined_call_operand.vmem [shape: f32[3,27], index: 3, kind: input, shape index: {}]   ;;  %s2316_s6 = inlined_call_operand.vmem [shape: f32[6,256], index: 6, kind: output, shape index: {}]  }
   0x1   :  { %25 = vst [vmem:[#allocation2 + $0x10] sm:$0x77] %v1660_v1  ;;  %26 = vst [vmem:[#allocation2 + $0x18] sm:$0x77] %v1660_v1  ;;  %789 = vmatprep.mubr.f32.mxu1 %v1660_v1  ;;  %718 = vmatprep.mubr.f32.mxu0 %v1660_v1  ;;  %s1663_s21 = smov 127   ;;  %s1664_s22 = smov 111  }
   0x2   :  { %23 = vst [vmem:[#allocation2] sm:$0x77] %v1660_v1  ;;  %24 = vst [vmem:[#allocation2 + $0x8] sm:$0x77] %v1660_v1  ;;  %v54_v2 = vshrl.u32 %v53_v0, 7  ;;  %s1665_s30 = smov 15  }
   0x3   :  { %v1560_v3 = vld [vmem:[%s2310_s5 + $0x1] ss:$2 sm:$0x3]  ;;  %v292_v5 = vld [vmem:[%s2310_s5] ss:$2 sm:$0x3]  ;;  %vm42_vm2 = vmor %vm40_vm0, %vm41_vm1 }
   0x4   :  { %v1558_v4 = vld [vmem:[%s2310_s5 + $0x1] ss:$2 sm:$0x3]  ;;  %v1721_v6 = vsub.s32 0, %v54_v2  ;;  %v1723_v7 = vsub.s32 1, %v54_v2  ;;  %s1666_s7 = smov 17  }
   0x5   :  { %v89_v8 = vld [vmem:[%s2310_s5] ss:$2 sm:$0x3]  ;;  %v1557_v13 = vld [vmem:[%s2310_s5 + $0x1] ss:$2 sm:$0x3] }
   0x6   :  { %v389_v9 = vrot.slane %v1560_v3, %v1721_v6  ;;  %v393_v10 = vrot.slane %v1560_v3, %v1723_v7  ;;  %v215_v11 = vrot.slane %v1558_v4, %v1721_v6  ;;  %v219_v12 = vrot.slane %v1558_v4, %v1723_v7  ;;  %v251_v18 = vld [vmem:[%s2310_s5] ss:$2 sm:$0x3]  ;;  %v1559_v21 = vld [vmem:[%s2310_s5 + $0x1] ss:$2 sm:$0x3] }
   0x7   :  { %v297_v14 = vrot.slane %v292_v5, %v1721_v6  ;;  %v301_v15 = vrot.slane %v292_v5, %v1723_v7  ;;  %v94_v16 = vrot.slane %v89_v8, %v1721_v6  ;;  %v98_v17 = vrot.slane %v89_v8, %v1723_v7  ;;  %v51_v25 = vld [vmem:[%s2310_s5] ss:$2 sm:$0x3]  ;;  %v1644_v26 = vld [vmem:[%s2311_s0] ss:$8 sps:$4 sm:$0x88]  }
   0x8   :  { %v394_v19 = vcombine.low %v389_v9, %v393_v10  ;;  %v220_v20 = vcombine.low %v215_v11, %v219_v12  ;;  %v172_v23 = vrot.slane %v1557_v13, %v1721_v6  ;;  %v176_v24 = vrot.slane %v1557_v13, %v1723_v7  ;;  %v1646_v30 = vld [vmem:[%s2311_s0 + $0x4] ss:$8 sps:$4 sm:$0x33]   ;;  %v1647_v31 = vld [vmem:[%s2311_s0] ss:$8 sps:$4 sm:$0x77]  }
   0x9   :  { %v302_v22 = vcombine.low %v297_v14, %v301_v15  ;;  %v99_v27 = vcombine.low %v94_v16, %v98_v17  ;;  %v256_v28 = vrot.slane %v251_v18, %v1721_v6  ;;  %v260_v29 = vrot.slane %v251_v18, %v1723_v7  ;;  %33 = vst [vmem:[#allocation2 + $0x4] sm:$0x77] %v1647_v31  ;;  %v464_v38 = vld [vmem:[%s2310_s5] ss:$2 sm:$0x3]  ;;  %s1667_s8 = smov 16  }
   0xa   :  { %395 = vrot.lane.b32.xlu1 %v394_v19, %s1661_s15  ;;  %221 = vrot.lane.b32.xlu0 %v220_v20, %s1662_s16  ;;  %v177_v32 = vcombine.low %v172_v23, %v176_v24  ;;  %v348_v33 = vrot.slane %v1559_v21, %v1721_v6  ;;  %v352_v34 = vrot.slane %v1559_v21, %v1723_v7  ;;  %v1556_v39 = vrot.slane %v1644_v26, 11  ;;  %v425_v40 = vld [vmem:[%s2310_s5] ss:$2 sm:$0x3]  ;;  %v502_v5 = vld [vmem:[#allocation2 + $0xc] sm:$0x7] }
   0xb   :  { %v261_v35 = vcombine.low %v256_v28, %v260_v29  ;;  %v56_v36 = vrot.slane %v51_v25, %v1721_v6  ;;  %v60_v37 = vrot.slane %v51_v25, %v1723_v7  ;;  %v45_v41 = vrot.slane %v1646_v30, 7  ;;  %v1562_v47 = vld [vmem:[%s2310_s5 + $0x1] ss:$2 sm:$0x3]  ;;  %v523_v9 = vld [vmem:[#allocation2 + $0x1c] sm:$0x7] }
   0xc   :  { %v353_v42 = vcombine.low %v348_v33, %v352_v34  ;;  %v469_v43 = vrot.slane %v464_v38, %v1721_v6  ;;  %v473_v44 = vrot.slane %v464_v38, %v1723_v7  ;;  %v430_v48 = vrot.slane %v425_v40, %v1721_v6  ;;  %v1561_v50 = vld [vmem:[%s2310_s5 + $0x1] ss:$2 sm:$0x3]  ;;  %s1668_s9 = smov 112  }
   0xd   :  { %v46_v45 = vsel %vm42_vm2, %v1556_v39, %v45_v41  ;;  %v61_v46 = vcombine.low %v56_v36, %v60_v37  ;;  %v434_v49 = vrot.slane %v425_v40, %v1723_v7  ;;  %v585_v51 = vrot.slane %v1562_v47, %v1721_v6 }
   0xe   :  { %303 = vrot.lane.b32.xlu0 %v302_v22, %s1663_s21  ;;  %100 = vrot.lane.b32.xlu1 %v99_v27, %s1664_s22  ;;  %48 = vst [vmem:[#allocation2 + $0x14] sm:$0x77] %v46_v45  ;;  %v589_v52 = vrot.slane %v1562_v47, %v1723_v7  ;;  %v549_v53 = vrot.slane %v1561_v50, %v1721_v6  ;;  %v508_v10 = vrot.slane %v502_v5, 3  ;;  %v529_v13 = vrot.slane %v523_v9, 3 }
   0xf   :  { %v474_v54 = vcombine.low %v469_v43, %v473_v44  ;;  %v435_v55 = vcombine.low %v430_v48, %v434_v49  ;;  %v553_v56 = vrot.slane %v1561_v50, %v1723_v7  ;;  %vm65_vm3 = vcmask 908288   ;;  %v579_v44 = vld [vmem:[#allocation2 + $0x1c] sm:$0x7]  ;;  %v543_v49 = vld [vmem:[#allocation2 + $0xc] sm:$0x7] }
  0x10   :  { %v590_v58 = vcombine.low %v585_v51, %v589_v52  ;;  %v123_v0 = vld [vmem:[#allocation2] sm:$0x77]  ;;  %v124_v2 = vld [vmem:[#allocation2 + $0x8] sm:$0x7]  ;;  %v1632_v16 = vpack.i.bf16 %v508_v10, %v529_v13  ;;  %vm80_vm4 = vcmask 138240   ;;  %vm137_vm5 = vcmask 130048  }
  0x11   :  { %v554_v59 = vcombine.low %v549_v53, %v553_v56  ;;  %v127_v4 = vcombine.high %v123_v0, %v123_v0  ;;  %v130_v8 = vrot.slane %v124_v2, 5  ;;  %v128_v14 = vrot.slane %v123_v0, 5  ;;  %v1805_v18 = vld [vmem:[#allocation2 + $0x4] sm:$0x77] }
  0x12   :  { %178 = vrot.lane.b32.xlu0 %v177_v32, %s1662_s16  ;;  %262 = vrot.lane.b32.xlu1 %v261_v35, %s1663_s21  ;;  %v505_v20 = vcombine.high %v1805_v18, %v1805_v18  ;;  %v50_v33 = vld [vmem:[#allocation2 + $0x8] sm:$0x7]  ;;  %v49_v0 = vld [vmem:[#allocation2] sm:$0x77]  ;;  %vm515_vm6 = vcmask 916480   ;;  %vm181_vm7 = vcmask 924672  }
  0x13   :  { %v129_v12 = vrot.slane %v127_v4, 5  ;;  %v165_v48 = vld [vmem:[#allocation2 + $0x8] sm:$0x7]  ;;  %vm265_vm8 = vcmask 1039360   ;;  %vm283_vm9 = vcmask 7168   ;;  %vm199_vm10 = vcmask 121856  }
  0x14   :  { %v507_v21 = vrot.slane %v505_v20, 3  ;;  %vm641_vm11 = vcmask 1042432   ;;  %vm1670_vm12 = vmmov 1   ;;  %vm637_vm14 = vcmask 220160  }
  0x15   :  { %v144_v57 = vld [vmem:[#allocation2 + $0x10] sm:$0x77]  ;;  %v145_v61 = vld [vmem:[#allocation2 + $0x18] sm:$0x7]  ;;  %vm2062_vm13 = vmpackc.low %vm641_vm11, %vm1670_vm12 }
  0x16   :  { %354 = vrot.lane.b32.xlu0 %v353_v42, %s1661_s15  ;;  %62 = vrot.lane.b32.xlu1 %v61_v46, %s1664_s22  ;;  %v148_v60 = vcombine.high %v144_v57, %v144_v57  ;;  %v151_v62 = vrot.slane %v145_v61, 5  ;;  %v149_v3 = vrot.slane %v144_v57, 5  ;;  %v522_v11 = vld [vmem:[#allocation2 + $0x14] sm:$0x77] }
  0x17   :  { %v526_v15 = vcombine.high %v522_v11, %v522_v11  ;;  %v527_v19 = vrot.slane %v522_v11, 3  ;;  %v88_v26 = vld [vmem:[#allocation2 + $0x18] sm:$0x7]  ;;  %v87_v39 = vld [vmem:[#allocation2 + $0x10] sm:$0x77] }
  0x18   :  { %v150_v63 = vrot.slane %v148_v60, 5  ;;  %v578_v47 = vld [vmem:[#allocation2 + $0x14] sm:$0x77] }
  0x19   :  { %v528_v17 = vrot.slane %v526_v15, 3  ;;  %v291_v15 = vld [vmem:[#allocation2 + $0x18] sm:$0x7] }
  0x1a   :  { %475 = vrot.lane.b32.xlu0 %v474_v54, %s1665_s30  ;;  %436 = vrot.lane.b32.xlu1 %v435_v55, %s1665_s30 }
  0x1e   :  { %591 = vrot.lane.b32.xlu0 %v590_v58, %s1666_s7  ;;  %555 = vrot.lane.b32.xlu1 %v554_v59, %s1666_s7  ;;  %v250_v58 = vld [vmem:[#allocation2 + $0x8] sm:$0x7] }
  0x22   :  { %156 = vrot.lane.b32.xlu1 %v151_v62, %s1667_s8  ;;  %154 = vrot.lane.b32.xlu0 %v150_v63, %s1667_s8 }
  0x26   :  { %152 = vrot.lane.b32.xlu1 %v149_v3, %s1667_s8  ;;  %135 = vrot.lane.b32.xlu0 %v130_v8, %s1667_s8  ;;  %v209_v3 = vld [vmem:[#allocation2 + $0x18] sm:$0x7]  ;;  %v342_v8 = vld [vmem:[#allocation2 + $0xc] sm:$0x7] }
  0x2a   :  { %133 = vrot.lane.b32.xlu1 %v129_v12, %s1667_s8  ;;  %131 = vrot.lane.b32.xlu0 %v128_v14, %s1667_s8 }
  0x2e   :  { %1633 = vrot.lane.b32.xlu1 %v1632_v16, %s1668_s9  ;;  %532 = vrot.lane.b32.xlu0 %v528_v17, %s1668_s9 }
  0x32   :  { %530 = vrot.lane.b32.xlu1 %v527_v19, %s1668_s9  ;;  %v424_v19 = vld [vmem:[#allocation2 + $0xc] sm:$0x7] }
  0x36   :  { %511 = vrot.lane.b32.xlu1 %v507_v21, %s1668_s9 }
  0x7c   :  { %v1813_v22 = vpop.permute.xlu1 %395  ;;  %v1815_v23 = vpop.permute.xlu0 %221 }
  0x7d   :  { %v223_v60 = vrot.slane %v1815_v23, 4 }
  0x7f   :  { %v228_v12 = vmul.f32 %v223_v60, %v209_v3 }
  0x80   :  { %v1817_v24 = vpop.permute.xlu0 %303  ;;  %v101_v25 = vpop.permute.xlu1 %100 }
  0x81   :  { %v102_v27 = vrot.slane %v101_v25, 4  ;;  %v305_v10 = vrot.slane %v1817_v24, 4 }
  0x83   :  { %v107_v28 = vmul.f32 %v102_v27, %v88_v26  ;;  %v103_v36 = vsel %vm65_vm3, %v102_v27, %v101_v25  ;;  %v397_v26 = vrot.slane %v1813_v22, 4  ;;  %v234_v27 = vrot.slane %v228_v12, 2 }
  0x84   :  { %v1819_v29 = vpop.permute.xlu0 %178  ;;  %v1821_v30 = vpop.permute.xlu1 %262  ;;  %v1832_v40 = vmul.f32 %v103_v36, %v87_v39 }
  0x85   :  { %115 = vrot.lane.b32.xlu1 %v107_v28, %s1666_s7  ;;  %v180_v41 = vrot.slane %v1819_v29, 4  ;;  %v264_v52 = vrot.slane %v1821_v30, 4  ;;  %v310_v28 = vmul.f32 %v305_v10, %v291_v15  ;;  %v341_v15 = vld [vmem:[#allocation2 + $0x4] sm:$0x77] }
  0x87   :  { %v186_v54 = vmul.f32 %v180_v41, %v165_v48  ;;  %v270_v2 = vmul.f32 %v264_v52, %v250_v58  ;;  %v182_v12 = vsel %vm181_vm7, %v180_v41, %v1819_v29  ;;  %v462_v29 = vld [vmem:[#allocation2 + $0x14] sm:$0x77] }
  0x88   :  { %v1824_v31 = vpop.permute.xlu0 %354  ;;  %v63_v32 = vpop.permute.xlu1 %62 }
  0x89   :  { %v64_v34 = vrot.slane %v63_v32, 4  ;;  %v356_v61 = vrot.slane %v1824_v31, 4  ;;  %v192_v63 = vrot.slane %v186_v54, 2  ;;  %v276_v13 = vrot.slane %v270_v2, 7 }
  0x8a   :  { %v224_v54 = vsel %vm181_vm7, %v223_v60, %v1815_v23  ;;  %v110_v23 = vcombine.high %v1832_v40, %v1832_v40  ;;  %v398_v2 = vsel %vm283_vm9, %v397_v26, %v1813_v22  ;;  %v266_v22 = vsel %vm265_vm8, %v264_v52, %v1821_v30 }
  0x8b   :  { %v70_v35 = vmul.f32 %v64_v34, %v50_v33  ;;  %v66_v62 = vsel %vm65_vm3, %v64_v34, %v63_v32  ;;  %v361_v14 = vmul.f32 %v356_v61, %v342_v8  ;;  %v383_v34 = vld [vmem:[#allocation2 + $0x1c] sm:$0x7]  ;;  %v249_v8 = vld [vmem:[#allocation2] sm:$0x77] }
  0x8c   :  { %v1827_v37 = vpop.permute.xlu0 %475  ;;  %v1829_v38 = vpop.permute.xlu1 %436  ;;  %v1861_v11 = vmul.f32 %v66_v62, %v49_v0  ;;  %v290_v62 = vld [vmem:[#allocation2 + $0x10] sm:$0x77] }
  0x8d   :  { %78 = vrot.lane.b32.xlu0 %v70_v35, %s1666_s7  ;;  %v438_v25 = vrot.slane %v1829_v38, 4  ;;  %v367_v32 = vrot.slane %v361_v14, 1  ;;  %v382_v0 = vld [vmem:[#allocation2 + $0x14] sm:$0x77] }
  0x8e   :  { %v73_v52 = vcombine.high %v1861_v11, %v1861_v11 }
  0x8f   :  { %v443_v33 = vmul.f32 %v438_v25, %v424_v19 }
  0x90   :  { %v592_v42 = vpop.permute.xlu0 %591  ;;  %v1835_v43 = vpop.permute.xlu1 %555 }
  0x91   :  { %v593_v45 = vrot.slane %v592_v42, 4  ;;  %111 = vrot.lane.b32.xlu0 %v1832_v40, %s1666_s7  ;;  %v557_v46 = vrot.slane %v1835_v43, 4  ;;  %v449_v48 = vrot.slane %v443_v33, 6 }
  0x93   :  { %v594_v50 = vsel %vm80_vm4, %v593_v45, %v592_v42  ;;  %v598_v51 = vmul.f32 %v593_v45, %v579_v44  ;;  %v562_v57 = vmul.f32 %v557_v46, %v543_v49  ;;  %v477_v42 = vrot.slane %v1827_v37, 4  ;;  %v463_v49 = vld [vmem:[#allocation2 + $0x1c] sm:$0x7] }
  0x94   :  { %v1842_v53 = vmul.f32 %v594_v50, %v578_v47  ;;  %v157_v55 = vpop.permute.xlu1 %156  ;;  %v155_v56 = vpop.permute.xlu0 %154  ;;  %v316_v44 = vrot.slane %v310_v28, 7  ;;  %v402_v45 = vmul.f32 %v397_v26, %v383_v34  ;;  %v542_v26 = vld [vmem:[#allocation2 + $0x4] sm:$0x77] }
  0x95   :  { %606 = vrot.lane.b32.xlu1 %v598_v51, %s1664_s22  ;;  %v159_v59 = vsel %vm137_vm5, %v155_v56, %v157_v55  ;;  %v208_v51 = vld [vmem:[#allocation2 + $0x10] sm:$0x77]  ;;  %v482_v58 = vmul.f32 %v477_v42, %v463_v49  ;;  %v478_v41 = vsel %vm199_vm10, %v477_v42, %v1827_v37  ;;  %v329_v37 = vld [vmem:[#allocation2 + $0x4] sm:$0x77] }
  0x96   :  { %602 = vrot.lane.b32.xlu0 %v1842_v53, %s1664_s22  ;;  %163 = vst [vmem:[#allocation3 + $0x18] sm:$0x38] %v159_v59  ;;  %v1883_v59 = vmul.f32 %v224_v54, %v208_v51  ;;  %334 = vst [vmem:[#allocation3 + $0x28] sm:$0x70] %v329_v37  ;;  %v331_v28 = vcombine.low %v329_v37, %v329_v37  ;;  %v423_v34 = vld [vmem:[#allocation2 + $0x4] sm:$0x77] }
  0x98   :  { %v153_v4 = vpop.permute.xlu1 %152  ;;  %v136_v5 = vpop.permute.xlu0 %135  ;;  %v232_v40 = vrot.slane %v1883_v59, 2  ;;  %333 = vst [vmem:[#allocation3 + $0x20] sm:$0x70] %v331_v28 }
  0x99   :  { %570 = vrot.lane.b32.xlu1 %v562_v57, %s1664_s22  ;;  %v158_v9 = vsel %vm137_vm5, %v153_v4, %v155_v56  ;;  %v408_v57 = vrot.slane %v402_v45, 1 }
  0x9a   :  { %197 = vrot.lane.b32.xlu0 %v192_v63, %s1665_s30  ;;  %162 = vst [vmem:[#allocation3 + $0x10] sm:$0x38] %v158_v9  ;;  %v306_v63 = vsel %vm265_vm8, %v305_v10, %v1817_v24  ;;  %v488_v24 = vrot.slane %v482_v58, 6  ;;  %v164_v10 = vld [vmem:[#allocation2] sm:$0x77] }
  0x9b   :  { %v1897_v4 = vmul.f32 %v306_v63, %v290_v62  ;;  %v185_v30 = vmul.f32 %v182_v12, %v164_v10  ;;  %v1570_v62 = vld [vmem:[%s2310_s5 + $0x1] ss:$2 sm:$0x3]  ;;  %v1669_v63 = vmov 0  }
  0x9c   :  { %v134_v16 = vpop.permute.xlu1 %133  ;;  %v132_v17 = vpop.permute.xlu0 %131  ;;  %1637 = vset.pattern.permute.xlu1 %v1669_v63  ;;  %1643 = vset.pattern.permute.xlu0 %v1669_v63 }
  0x9d   :  { %74 = vrot.lane.b32.xlu1 %v1861_v11, %s1666_s7  ;;  %v139_v20 = vsel %vm137_vm5, %v134_v16, %v136_v5  ;;  %v138_v21 = vsel %vm137_vm5, %v132_v17, %v134_v16  ;;  %v1899_v5 = vmul.f32 %v398_v2, %v382_v0  ;;  %v314_v9 = vrot.slane %v1897_v4, 7  ;;  %v1572_v2 = vld [vmem:[%s2310_s5 + $0x1] ss:$2 sm:$0x3] }
  0x9e   :  { %281 = vrot.lane.b32.xlu0 %v276_v13, %s1661_s15  ;;  %143 = vst [vmem:[#allocation3 + $0x8] sm:$0x38] %v139_v20  ;;  %142 = vst [vmem:[#allocation3] sm:$0x38] %v138_v21  ;;  %v269_v13 = vmul.f32 %v266_v22, %v249_v8  ;;  %v357_v16 = vsel %vm283_vm9, %v356_v61, %v1824_v31  ;;  %v190_v20 = vrot.slane %v185_v30, 2 }
  0x9f   :  { %v406_v14 = vrot.slane %v1899_v5, 1  ;;  %v360_v19 = vmul.f32 %v357_v16, %v341_v15  ;;  %v481_v21 = vmul.f32 %v478_v41, %v462_v29  ;;  %v601_v11 = vcombine.high %v1842_v53, %v1842_v53  ;;  %v844_v22 = vld [vmem:[%s2310_s5] ss:$2 sm:$0x3] }
  0xa0   :  { %v1634_v35 = vpop.permute.xlu1 %1633  ;;  %v533_v36 = vpop.permute.xlu0 %532  ;;  %v274_v17 = vrot.slane %v269_v13, 7  ;;  %v558_v31 = vsel %vm80_vm4, %v557_v46, %v1835_v43  ;;  %v439_v53 = vsel %vm199_vm10, %v438_v25, %v1829_v38  ;;  %v273_v46 = vcombine.high %v269_v13, %v269_v13  ;;  %v1571_v16 = vld [vmem:[%s2310_s5 + $0x1] ss:$2 sm:$0x3] }
  0xa1   :  { %239 = vrot.lane.b32.xlu1 %v234_v27, %s1665_s30  ;;  %v1635_v39 = vunpack.i.l.bf16 %v1634_v35  ;;  %v1636_v55 = vunpack.i.h.bf16 %v1634_v35  ;;  %v365_v61 = vrot.slane %v360_v19, 1  ;;  %v189_v27 = vcombine.high %v185_v30, %v185_v30 }
  0xa2   :  { %372 = vrot.lane.b32.xlu0 %v367_v32, %s1663_s21  ;;  %v561_v32 = vmul.f32 %v558_v31, %v542_v26  ;;  %v486_v33 = vrot.slane %v481_v21, 6  ;;  %v442_v35 = vmul.f32 %v439_v53, %v423_v34  ;;  %v364_v42 = vcombine.high %v360_v19, %v360_v19  ;;  %v1213_v26 = vld [vmem:[%s2310_s5] ss:$2 sm:$0x3] }
  0xa3   :  { %v537_v47 = vsel %vm515_vm6, %v533_v36, %v1635_v39  ;;  %v191_v43 = vrot.slane %v189_v27, 2  ;;  %v275_v39 = vrot.slane %v273_v46, 7  ;;  %v231_v38 = vcombine.high %v1883_v59, %v1883_v59  ;;  %v1574_v34 = vld [vmem:[%s2310_s5 + $0x1] ss:$2 sm:$0x3] }
  0xa4   :  { %v531_v50 = vpop.permute.xlu1 %530  ;;  %541 = vst [vmem:[#allocation3 + $0x58] sm:$0xe0] %v537_v47  ;;  %v447_v45 = vrot.slane %v442_v35, 6  ;;  %v366_v47 = vrot.slane %v364_v42, 1  ;;  %v485_v58 = vcombine.high %v481_v21, %v481_v21  ;;  %v970_v0 = vrot.slane %v1570_v62, %v1723_v7 }
  0xa5   :  { %321 = vrot.lane.b32.xlu1 %v316_v44, %s1661_s15  ;;  %v536_v56 = vsel %vm515_vm6, %v531_v50, %v533_v36  ;;  %v565_v36 = vcombine.high %v561_v32, %v561_v32  ;;  %v335_v44 = vld [vmem:[#allocation2 + $0x14] sm:$0x77]  ;;  %v233_v49 = vrot.slane %v231_v38, 2  ;;  %v313_v50 = vcombine.high %v1897_v4, %v1897_v4  ;;  %v1573_v42 = vld [vmem:[%s2310_s5 + $0x1] ss:$2 sm:$0x3] }
  0xa6   :  { %454 = vrot.lane.b32.xlu0 %v449_v48, %s1662_s16  ;;  %540 = vst [vmem:[#allocation3 + $0x50] sm:$0xe0] %v536_v56  ;;  %340 = vst [vmem:[#allocation3 + $0x38] sm:$0x70] %v335_v44  ;;  %v337_v25 = vcombine.low %v335_v44, %v335_v44  ;;  %v446_v48 = vcombine.high %v442_v35, %v442_v35  ;;  %v506_v56 = vrot.slane %v1805_v18, 3  ;;  %v487_v59 = vrot.slane %v485_v58, 6 }
  0xa7   :  { %v315_v54 = vrot.slane %v313_v50, 7  ;;  %v631_v18 = vld [vmem:[%s2312_s2] sm:$0x7]  ;;  %v1142_v4 = vrot.slane %v1572_v2, %v1723_v7  ;;  %v853_v30 = vrot.slane %v844_v22, %v1723_v7  ;;  %v1101_v21 = vrot.slane %v1571_v16, %v1723_v7 }
  0xa8   :  { %v1889_v60 = vpop.permute.xlu1 %511  ;;  %339 = vst [vmem:[#allocation3 + $0x30] sm:$0x70] %v337_v25  ;;  %v448_v51 = vrot.slane %v446_v48, 6  ;;  %v1218_v28 = vrot.slane %v1213_v26, %v1721_v6  ;;  %v1301_v38 = vrot.slane %v1573_v42, %v1723_v7 }
  0xa9   :  { %413 = vrot.lane.b32.xlu1 %v408_v57, %s1663_s21  ;;  %v517_v3 = vsel %vm515_vm6, %v1889_v60, %v1636_v55  ;;  %v405_v55 = vcombine.high %v1899_v5, %v1899_v5  ;;  %v1041_v5 = vld [vmem:[%s2310_s5] ss:$2 sm:$0x3] }
  0xaa   :  { %113 = vrot.lane.b32.xlu0 %v110_v23, %s1666_s7  ;;  %521 = vst [vmem:[#allocation3 + $0x48] sm:$0xe0] %v517_v3  ;;  %v966_v23 = vrot.slane %v1570_v62, %v1721_v6  ;;  %v1138_v3 = vrot.slane %v1572_v2, %v1721_v6  ;;  %v1046_v8 = vrot.slane %v1041_v5, %v1721_v6 }
  0xab   :  { %v407_v57 = vrot.slane %v405_v55, 1  ;;  %v1050_v10 = vrot.slane %v1041_v5, %v1723_v7 }
  0xac   :  { %v1143_v12 = vcombine.low %v1138_v3, %v1142_v4 }
  0xad   :  { %493 = vrot.lane.b32.xlu1 %v488_v24, %s1662_s16  ;;  %v1569_v24 = vld [vmem:[%s2310_s5 + $0x1] ss:$2 sm:$0x3]  ;;  %v1051_v15 = vcombine.low %v1046_v8, %v1050_v10 }
  0xae   :  { %235 = vrot.lane.b32.xlu0 %v232_v40, %s1665_s30  ;;  %v971_v40 = vcombine.low %v966_v23, %v970_v0  ;;  %v929_v13 = vrot.slane %v1569_v24, %v1723_v7 }
  0xb1   :  { %317 = vrot.lane.b32.xlu1 %v314_v9, %s1661_s15  ;;  %v925_v9 = vrot.slane %v1569_v24, %v1721_v6 }
  0xb2   :  { %409 = vrot.lane.b32.xlu0 %v406_v14, %s1663_s21  ;;  %v849_v14 = vrot.slane %v844_v22, %v1721_v6 }
  0xb3   :  { %v930_v19 = vcombine.low %v925_v9, %v929_v13 }
  0xb5   :  { %76 = vrot.lane.b32.xlu1 %v73_v52, %s1666_s7  ;;  %v1002_v52 = vld [vmem:[%s2310_s5] ss:$2 sm:$0x3] }
  0xb6   :  { %277 = vrot.lane.b32.xlu0 %v274_v17, %s1661_s15  ;;  %v854_v17 = vcombine.low %v849_v14, %v853_v30  ;;  %v1007_v29 = vrot.slane %v1002_v52, %v1721_v6  ;;  %v1011_v41 = vrot.slane %v1002_v52, %v1723_v7 }
  0xb8   :  { %v1012_v31 = vcombine.low %v1007_v29, %v1011_v41 }
  0xb9   :  { %193 = vrot.lane.b32.xlu1 %v190_v20, %s1665_s30  ;;  %v1097_v20 = vrot.slane %v1571_v16, %v1721_v6 }
  0xba   :  { %604 = vrot.lane.b32.xlu0 %v601_v11, %s1664_s22  ;;  %v808_v11 = vld [vmem:[%s2310_s5] ss:$2 sm:$0x3] }
  0xbb   :  { %v813_v37 = vrot.slane %v808_v11, %v1721_v6  ;;  %v1102_v27 = vcombine.low %v1097_v20, %v1101_v21 }
  0xbd   :  { %368 = vrot.lane.b32.xlu1 %v365_v61, %s1663_s21  ;;  %v817_v61 = vrot.slane %v808_v11, %v1723_v7 }
  0xbe   :  { %489 = vrot.lane.b32.xlu0 %v486_v33, %s1662_s16  ;;  %v1174_v33 = vld [vmem:[%s2310_s5] ss:$2 sm:$0x3] }
  0xbf   :  { %v818_v53 = vcombine.low %v813_v37, %v817_v61  ;;  %v1183_v46 = vrot.slane %v1174_v33, %v1723_v7 }
  0xc1   :  { %195 = vrot.lane.b32.xlu1 %v191_v43, %s1665_s30  ;;  %v1179_v43 = vrot.slane %v1174_v33, %v1721_v6 }
  0xc2   :  { %568 = vrot.lane.b32.xlu0 %v565_v36, %s1664_s22  ;;  %v1333_v36 = vrot.slane %v1574_v34, %v1721_v6 }
  0xc3   :  { %v1184_v44 = vcombine.low %v1179_v43, %v1183_v46 }
  0xc5   :  { %279 = vrot.lane.b32.xlu1 %v275_v39, %s1661_s15  ;;  %v1337_v39 = vrot.slane %v1574_v34, %v1723_v7 }
  0xc6   :  { %450 = vrot.lane.b32.xlu0 %v447_v45, %s1662_s16  ;;  %v1297_v45 = vrot.slane %v1573_v42, %v1721_v6 }
  0xc7   :  { %v1338_v25 = vcombine.low %v1333_v36, %v1337_v39 }
  0xc9   :  { %370 = vrot.lane.b32.xlu1 %v366_v47, %s1663_s21  ;;  %v1302_v47 = vcombine.low %v1297_v45, %v1301_v38 }
  0xca   :  { %237 = vrot.lane.b32.xlu0 %v233_v49, %s1665_s30 }
  0xcd   :  { %452 = vrot.lane.b32.xlu1 %v448_v51, %s1662_s16 }
  0xce   :  { %319 = vrot.lane.b32.xlu0 %v315_v54, %s1661_s15 }
  0xd1   :  { %509 = vrot.lane.b32.xlu1 %v506_v56, %s1668_s9 }
  0xd2   :  { %411 = vrot.lane.b32.xlu0 %v407_v57, %s1663_s21 }
  0xd5   :  { %634 = vperm.xlu1 %1637, %v631_v18  }
  0xd6   :  { %491 = vrot.lane.b32.xlu0 %v487_v59, %s1662_s16 }
  0xd9   :  { %1052 = vrot.lane.b32.xlu1 %v1051_v15, %s1663_s21 }
  0xda   :  { %566 = vrot.lane.b32.xlu0 %v561_v32, %s1664_s22  ;;  %v1222_v32 = vrot.slane %v1213_v26, %v1723_v7 }
  0xdc   :  { %v1223_v35 = vcombine.low %v1218_v28, %v1222_v32 }
  0xdd   :  { %855 = vrot.lane.b32.xlu1 %v854_v17, %s1664_s22 }
  0xde   :  { %972 = vrot.lane.b32.xlu0 %v971_v40, %s1662_s16 }
  0xe1   :  { %1013 = vrot.lane.b32.xlu1 %v1012_v31, %s1663_s21 }
  0xe2   :  { %1144 = vrot.lane.b32.xlu0 %v1143_v12, %s1661_s15 }
  0xe5   :  { %819 = vrot.lane.b32.xlu1 %v818_v53, %s1664_s22 }
  0xe6   :  { %931 = vrot.lane.b32.xlu0 %v930_v19, %s1662_s16 }
  0xe9   :  { %1185 = vrot.lane.b32.xlu1 %v1184_v44, %s1665_s30 }
  0xea   :  { %1103 = vrot.lane.b32.xlu0 %v1102_v27, %s1661_s15 }
  0xed   :  { %1303 = vrot.lane.b32.xlu1 %v1302_v47, %s1666_s7 }
  0xee   :  { %1224 = vrot.lane.b32.xlu0 %v1223_v35, %s1665_s30 }
  0xf2   :  { %1339 = vrot.lane.b32.xlu0 %v1338_v25, %s1666_s7 }
  0xf7   :  { %v116_v49 = vpop.permute.xlu1 %115 }
  0xff   :  { %v79_v48 = vpop.permute.xlu0 %78 }
 0x103   :  { %v112_v50 = vpop.permute.xlu0 %111 }
 0x107   :  { %v607_v51 = vpop.permute.xlu1 %606 }
 0x108   :  { %v603_v54 = vpop.permute.xlu0 %602 }
 0x10b   :  { %v571_v55 = vpop.permute.xlu1 %570 }
 0x10c   :  { %v198_v56 = vpop.permute.xlu0 %197 }
 0x10f   :  { %v75_v6 = vpop.permute.xlu1 %74 }
 0x110   :  { %v282_v57 = vpop.permute.xlu0 %281 }
 0x113   :  { %v240_v7 = vpop.permute.xlu1 %239 }
 0x114   :  { %v373_v58 = vpop.permute.xlu0 %372 }
 0x117   :  { %v322_v59 = vpop.permute.xlu1 %321 }
 0x118   :  { %v455_v62 = vpop.permute.xlu0 %454 }
 0x11b   :  { %v2034_v63 = vpop.permute.xlu1 %413 }
 0x11c   :  { %v114_v18 = vpop.permute.xlu0 %113 }
 0x11d   :  { %v117_v23 = vsel %vm80_vm4, %v112_v50, %v114_v18  ;;  %v118_v0 = vsel %vm80_vm4, %v114_v18, %v116_v49 }
 0x11e   :  { %121 = vst [vmem:[#allocation3 + $0x10] sm:$0x7] %v117_v23  ;;  %122 = vst [vmem:[#allocation3 + $0x18] sm:$0x7] %v118_v0 }
 0x11f   :  { %v2038_v2 = vpop.permute.xlu1 %493 }
 0x120   :  { %v236_v3 = vpop.permute.xlu0 %235 }
 0x123   :  { %v318_v4 = vpop.permute.xlu1 %317 }
 0x124   :  { %v410_v24 = vpop.permute.xlu0 %409 }
 0x127   :  { %v77_v5 = vpop.permute.xlu1 %76 }
 0x128   :  { %v81_v40 = vsel %vm80_vm4, %v75_v6, %v77_v5  ;;  %v82_v8 = vsel %vm80_vm4, %v77_v5, %v79_v48  ;;  %v278_v22 = vpop.permute.xlu0 %277 }
 0x129   :  { %85 = vst [vmem:[#allocation3] sm:$0x7] %v81_v40  ;;  %86 = vst [vmem:[#allocation3 + $0x8] sm:$0x7] %v82_v8 }
 0x12b   :  { %v194_v9 = vpop.permute.xlu1 %193 }
 0x12c   :  { %v605_v10 = vpop.permute.xlu0 %604 }
 0x12d   :  { %v608_v12 = vsel %vm65_vm3, %v603_v54, %v605_v10  ;;  %v609_v13 = vsel %vm65_vm3, %v605_v10, %v607_v51  ;;  %v1132_v10 = vld [vmem:[#allocation2 + $0x1c] sm:$0x7] }
 0x12e   :  { %612 = vst [vmem:[#allocation3 + $0x70] sm:$0x7] %v608_v12  ;;  %613 = vst [vmem:[#allocation3 + $0x78] sm:$0x7] %v609_v13 }
 0x12f   :  { %v369_v14 = vpop.permute.xlu1 %368 }
 0x130   :  { %v490_v30 = vpop.permute.xlu0 %489 }
 0x133   :  { %v196_v52 = vpop.permute.xlu1 %195 }
 0x134   :  { %v200_v15 = vsel %vm199_vm10, %v194_v9, %v196_v52  ;;  %v201_v16 = vsel %vm199_vm10, %v196_v52, %v198_v56  ;;  %v569_v17 = vpop.permute.xlu0 %568 }
 0x135   :  { %204 = vst [vmem:[#allocation3 + $0x20] ss:$-28 sps:$4 sm:$0xc1] %v200_v15   ;;  %205 = vst [vmem:[#allocation3 + $0x28] ss:$-28 sps:$4 sm:$0xc1] %v201_v16   ;;  %v573_v29 = vsel %vm65_vm3, %v569_v17, %v571_v55 }
 0x136   :  { %577 = vst [vmem:[#allocation3 + $0x68] sm:$0x7] %v573_v29  ;;  %v630_v23 = vld [vmem:[#allocation3 + $0x78] sm:$0x7] }
 0x137   :  { %v280_v41 = vpop.permute.xlu1 %279 }
 0x138   :  { %v284_v19 = vsel %vm283_vm9, %v278_v22, %v280_v41  ;;  %v285_v20 = vsel %vm283_vm9, %v280_v41, %v282_v57  ;;  %v451_v21 = vpop.permute.xlu0 %450  ;;  %v614_v22 = vld [vmem:[%s2313_s1] sm:$0x7] }
 0x139   :  { %288 = vst [vmem:[#allocation3 + $0x20] sm:$0xe] %v284_v19  ;;  %289 = vst [vmem:[#allocation3 + $0x28] sm:$0xe] %v285_v20 }
 0x13b   :  { %v371_v11 = vpop.permute.xlu1 %370 }
 0x13c   :  { %v374_v26 = vsel %vm265_vm8, %v369_v14, %v371_v11  ;;  %v375_v31 = vsel %vm265_vm8, %v371_v11, %v373_v58  ;;  %v238_v37 = vpop.permute.xlu0 %237  ;;  %v616_v35 = vld [vmem:[#allocation3 + $0x8] sm:$0xff]  ;;  %v615_v44 = vld [vmem:[#allocation3] sm:$0xff] }
 0x13d   :  { %378 = vst [vmem:[#allocation3 + $0x40] ss:$-28 sps:$4 sm:$0x83] %v374_v26   ;;  %379 = vst [vmem:[#allocation3 + $0x48] ss:$-28 sps:$4 sm:$0x83] %v375_v31   ;;  %v241_v61 = vsel %vm199_vm10, %v236_v3, %v238_v37  ;;  %v242_v27 = vsel %vm199_vm10, %v238_v37, %v240_v7 }
 0x13e   :  { %245 = vst [vmem:[#allocation3 + $0x30] ss:$-28 sps:$4 sm:$0xc1] %v241_v61   ;;  %246 = vst [vmem:[#allocation3 + $0x38] ss:$-28 sps:$4 sm:$0xc1] %v242_v27  }
 0x13f   :  { %v453_v28 = vpop.permute.xlu1 %452  ;;  %v629_v3 = vld [vmem:[#allocation3 + $0x70] sm:$0x7]  ;;  %v1212_v26 = vld [vmem:[#allocation2 + $0x1c] sm:$0x7]  ;;  %v1091_v27 = vld [vmem:[#allocation2 + $0xc] sm:$0x7] }
 0x140   :  { %v456_v32 = vsel %vm181_vm7, %v451_v21, %v453_v28  ;;  %v457_v33 = vsel %vm181_vm7, %v453_v28, %v455_v62  ;;  %v320_v34 = vpop.permute.xlu0 %319  ;;  %v1251_v28 = vld [vmem:[#allocation2 + $0xc] sm:$0x7] }
 0x141   :  { %460 = vst [vmem:[#allocation3 + $0x40] sm:$0x1c] %v456_v32  ;;  %461 = vst [vmem:[#allocation3 + $0x48] sm:$0x1c] %v457_v33  ;;  %v323_v53 = vsel %vm283_vm9, %v318_v4, %v320_v34  ;;  %v324_v43 = vsel %vm283_vm9, %v320_v34, %v322_v59  ;;  %v1271_v32 = vld [vmem:[#allocation2 + $0x1c] sm:$0x7] }
 0x142   :  { %327 = vst [vmem:[#allocation3 + $0x30] sm:$0xe] %v323_v53  ;;  %328 = vst [vmem:[#allocation3 + $0x38] sm:$0xe] %v324_v43  ;;  %v1257_v33 = vrot.slane %v1251_v28, 3  ;;  %v1277_v34 = vrot.slane %v1271_v32, 3 }
 0x143   :  { %v510_v46 = vpop.permute.xlu1 %509 }
 0x144   :  { %v516_v36 = vsel %vm515_vm6, %v510_v46, %v1889_v60  ;;  %v412_v39 = vpop.permute.xlu0 %411  ;;  %v620_v42 = vld [vmem:[#allocation3 + $0x28] sm:$0xff]  ;;  %v619_v45 = vld [vmem:[#allocation3 + $0x20] sm:$0xff]  ;;  %v1638_v43 = vpack.i.bf16 %v1257_v33, %v1277_v34 }
 0x145   :  { %520 = vst [vmem:[#allocation3 + $0x40] sm:$0xe0] %v516_v36  ;;  %v415_v38 = vsel %vm265_vm8, %v410_v24, %v412_v39  ;;  %v416_v25 = vsel %vm265_vm8, %v412_v39, %v2034_v63  ;;  %v1581_v47 = vpack.c.bf16 %v620_v42, %v616_v35  ;;  %v1583_v48 = vpack.c.bf16 %v619_v45, %v615_v44  ;;  %v628_v60 = vld [vmem:[#allocation3 + $0x68] sm:$0x7]  ;;  %v618_v57 = vld [vmem:[#allocation3 + $0x18] sm:$0xff]  ;;  %v617_v59 = vld [vmem:[#allocation3 + $0x10] sm:$0xff] }
 0x146   :  { %419 = vst [vmem:[#allocation3 + $0x50] ss:$-28 sps:$4 sm:$0x83] %v415_v38   ;;  %420 = vst [vmem:[#allocation3 + $0x58] ss:$-28 sps:$4 sm:$0x83] %v416_v25  }
 0x147   :  { %1582 = vmatprep.subr.bf16.mxu0 %v1581_v47  ;;  %v1327_v42 = vld [vmem:[#allocation2 + $0x1c] sm:$0x7]  ;;  %v1173_v25 = vld [vmem:[#allocation2 + $0xc] sm:$0x7] }
 0x148   :  { %v492_v49 = vpop.permute.xlu0 %491  ;;  %1584 = vmatpush1.bf16.msra.mxu0 %v1583_v48  ;;  %v624_v50 = vld [vmem:[#allocation3 + $0x48] sm:$0xff] }
 0x149   :  { %v495_v54 = vsel %vm181_vm7, %v490_v30, %v492_v49  ;;  %v496_v55 = vsel %vm181_vm7, %v492_v49, %v2038_v2  ;;  %v1585_v56 = vpack.c.bf16 %v628_v60, %v624_v50  ;;  %v1291_v50 = vld [vmem:[#allocation2 + $0xc] sm:$0x7] }
 0x14a   :  { %499 = vst [vmem:[#allocation3 + $0x50] sm:$0x1c] %v495_v54  ;;  %500 = vst [vmem:[#allocation3 + $0x58] sm:$0x1c] %v496_v55 }
 0x14b   :  { %1587 = vmatprep.subr.msk.bf16.mxu0 %vm2062_vm13, %v1585_v56 }
 0x14c   :  { %v567_v6 = vpop.permute.xlu0 %566  ;;  %v623_v40 = vld [vmem:[#allocation3 + $0x40] sm:$0xff] }
 0x14d   :  { %v572_v7 = vsel %vm65_vm3, %v567_v6, %v569_v17  ;;  %v622_v58 = vld [vmem:[#allocation3 + $0x38] sm:$0xff]  ;;  %v621_v62 = vld [vmem:[#allocation3 + $0x30] sm:$0xff] }
 0x14e   :  { %576 = vst [vmem:[#allocation3 + $0x60] sm:$0x7] %v572_v7  ;;  %v1591_v63 = vpack.c.bf16 %v622_v58, %v618_v57  ;;  %v1593_v18 = vpack.c.bf16 %v621_v62, %v617_v59 }
 0x150   :  { %1592 = vmatprep.subr.bf16.mxu1 %v1591_v63  ;;  %v2072_v5 = vpop.permute.xlu0 %972 }
 0x151   :  { %1594 = vmatpush1.bf16.msra.mxu1 %v1593_v18  ;;  %v626_v0 = vld [vmem:[#allocation3 + $0x58] sm:$0xff]  ;;  %v625_v2 = vld [vmem:[#allocation3 + $0x50] sm:$0xff]  ;;  %v974_v34 = vrot.slane %v2072_v5, 4 }
 0x152   :  { %v1595_v4 = vpack.c.bf16 %v630_v23, %v626_v0  ;;  %v1598_v24 = vpack.c.bf16 %v629_v3, %v625_v2 }
 0x154   :  { %1597 = vmatprep.subr.msk.bf16.mxu1 %vm2062_vm13, %v1595_v4  ;;  %v1145_v12 = vpop.permute.xlu0 %1144  ;;  %v635_v41 = vpop.permute.xlu1 %634 }
 0x155   :  { %1600 = vmatpush1.bf16.msk.msra.mxu1 %vm2062_vm13, %v1598_v24  ;;  %v627_v8 = vld [vmem:[#allocation3 + $0x60] sm:$0x7]  ;;  %v1146_v13 = vrot.slane %v1145_v12, 4 }
 0x156   :  { %v1588_v9 = vpack.c.bf16 %v627_v8, %v623_v40 }
 0x157   :  { %v2085_v14 = vsel %vm283_vm9, %v1146_v13, %v1145_v12  ;;  %v1151_v30 = vmul.f32 %v1146_v13, %v1132_v10 }
 0x158   :  { %1590 = vmatpush1.bf16.msk.msra.mxu0 %vm2062_vm13, %v1588_v9  ;;  %1568 = vmatmul.mubr.msk.f32.vlgmr.msra.gmra.mrb[0].mxu1 %vm637_vm14, %v614_v22  ;;  %v2088_v52 = vpop.permute.xlu0 %931  ;;  %v2096_v19 = vpop.permute.xlu1 %1052 }
 0x159   :  { %1535 = vmatprep.mubr.f32.mxu1 %v1660_v1  ;;  %v1157_v15 = vrot.slane %v1151_v30, 1 }
 0x15b   :  { %1565 = vmatmul.mubr.msk.f32.vlgmr.msra.gmra.mrb[0].mxu0 %vm637_vm14, %v614_v22  ;;  %1162 = vrot.lane.b32.xlu1 %v1157_v15, %s1663_s21 }
 0x15c   :  { %1464 = vmatprep.mubr.f32.mxu0 %v1660_v1  ;;  %v1104_v16 = vpop.permute.xlu0 %1103  ;;  %v856_v20 = vpop.permute.xlu1 %855 }
 0x15d   :  { %v1105_v17 = vrot.slane %v1104_v16, 4  ;;  %v857_v23 = vrot.slane %v856_v20, 4 }
 0x15f   :  { %v2094_v29 = vsel %vm283_vm9, %v1105_v17, %v1104_v16  ;;  %v1110_v53 = vmul.f32 %v1105_v17, %v1091_v27  ;;  %v858_v0 = vsel %vm65_vm3, %v857_v23, %v856_v20 }
 0x160   :  { %v2098_v21 = vpop.permute.xlu0 %1224  ;;  %v2101_v31 = vpop.permute.xlu1 %1013 }
 0x161   :  { %v1226_v11 = vrot.slane %v2098_v21, 4  ;;  %v1116_v38 = vrot.slane %v1110_v53, 1 }
 0x163   :  { %v1231_v1 = vmul.f32 %v1226_v11, %v1212_v26  ;;  %1121 = vrot.lane.b32.xlu0 %v1116_v38, %s1663_s21 }
 0x164   :  { %v2105_v37 = vpop.permute.xlu1 %819  ;;  %v2108_v46 = vpop.permute.xlu0 %1339 }
 0x165   :  { %v1237_v61 = vrot.slane %v1231_v1, 6  ;;  %v1341_v36 = vrot.slane %v2108_v46, 4  ;;  %v821_v40 = vrot.slane %v2105_v37, 4 }
 0x167   :  { %1242 = vrot.lane.b32.xlu1 %v1237_v61, %s1662_s16  ;;  %v1346_v44 = vmul.f32 %v1341_v36, %v1327_v42  ;;  %v822_v26 = vsel %vm65_vm3, %v821_v40, %v2105_v37  ;;  %v1342_v28 = vsel %vm80_vm4, %v1341_v36, %v2108_v46  ;;  %v1054_v46 = vrot.slane %v2096_v19, 4 }
 0x168   :  { %v1186_v35 = vpop.permute.xlu1 %1185 }
 0x169   :  { %v1187_v39 = vrot.slane %v1186_v35, 4 }
 0x16b   :  { %1639 = vrot.lane.b32.xlu1 %v1638_v43, %s1668_s9  ;;  %v2113_v45 = vsel %vm199_vm10, %v1187_v39, %v1186_v35  ;;  %v1192_v48 = vmul.f32 %v1187_v39, %v1173_v25 }
 0x16c   :  { %v2115_v47 = vpop.permute.xlu1 %1303 }
 0x16d   :  { %v1305_v49 = vrot.slane %v2115_v47, 4  ;;  %v1198_v54 = vrot.slane %v1192_v48, 6 }
 0x16f   :  { %1354 = vrot.lane.b32.xlu1 %v1346_v44, %s1664_s22  ;;  %v1310_v60 = vmul.f32 %v1305_v49, %v1291_v50  ;;  %1203 = vrot.lane.b32.xlu0 %v1198_v54, %s1662_s16  ;;  %v1055_v54 = vsel %vm265_vm8, %v1054_v46, %v2096_v19  ;;  %v933_v19 = vrot.slane %v2088_v52, 4 }
 0x173   :  { %1318 = vrot.lane.b32.xlu1 %v1310_v60, %s1664_s22  ;;  %v975_v60 = vsel %vm181_vm7, %v974_v34, %v2072_v5 }
 0x22b   :  { %v791_v55 = vpop.f32.mrb[0].mxu1 }
 0x22c   :  { %v792_v56 = vadd.f32 %v791_v55, %v635_v41  ;;  %v793_v6 = vpop.f32.mrb[1].mxu1 }
 0x22d   :  { %v794_v57 = vadd.f32 %v793_v6, %v635_v41 }
 0x22e   :  { %v720_v7 = vpop.f32.mrb[0].mxu0 }
 0x22f   :  { %v803_v58 = vcombine.low %v792_v56, %v794_v57  ;;  %v721_v59 = vadd.f32 %v720_v7, %v635_v41  ;;  %v722_v62 = vpop.f32.mrb[1].mxu0 }
 0x230   :  { %v723_v63 = vadd.f32 %v722_v62, %v635_v41 }
 0x231   :  { %805 = vst [vmem:[#allocation2 + $0x14] sm:$0x77] %v803_v58 }
 0x232   :  { %v798_v18 = vcombine.low %v721_v59, %v723_v63 }
 0x234   :  { %800 = vst [vmem:[#allocation2 + $0x4] sm:$0x77] %v798_v18 }
 0x238   :  { %v842_v2 = vld [vmem:[#allocation2 + $0x10] sm:$0x77]  ;;  %v843_v3 = vld [vmem:[#allocation2 + $0x18] sm:$0x7] }
 0x239   :  { %v861_v4 = vmul.f32 %v858_v0, %v842_v2  ;;  %v862_v24 = vmul.f32 %v857_v23, %v843_v3  ;;  %v899_v8 = vld [vmem:[#allocation2 + $0x18] sm:$0x7]  ;;  %v898_v13 = vld [vmem:[#allocation2 + $0x10] sm:$0x77] }
 0x23a   :  { %v905_v10 = vrot.slane %v899_v8, 5  ;;  %v903_v15 = vrot.slane %v898_v13, 5  ;;  %v1084_v20 = vld [vmem:[#allocation2 + $0x14] sm:$0x77]  ;;  %v902_v38 = vcombine.high %v898_v13, %v898_v13 }
 0x23b   :  { %866 = vrot.lane.b32.xlu0 %v861_v4, %s1666_s7  ;;  %870 = vrot.lane.b32.xlu1 %v862_v24, %s1666_s7  ;;  %v807_v22 = vld [vmem:[#allocation2 + $0x8] sm:$0x7]  ;;  %v2130_v16 = vld [vmem:[#allocation2] sm:$0x77]  ;;  %1089 = vst [vmem:[#allocation3 + $0x38] sm:$0x70] %v1084_v20  ;;  %v1086_v39 = vcombine.low %v1084_v20, %v1084_v20  ;;  %v865_v36 = vcombine.high %v861_v4, %v861_v4 }
 0x23c   :  { %v826_v9 = vmul.f32 %v821_v40, %v807_v22  ;;  %v879_v12 = vld [vmem:[#allocation2 + $0x8] sm:$0x7]  ;;  %v806_v17 = vld [vmem:[#allocation2] sm:$0x77]  ;;  %v883_v1 = vrot.slane %v2130_v16, 5  ;;  %v904_v55 = vrot.slane %v902_v38, 5  ;;  %v882_v63 = vcombine.high %v2130_v16, %v2130_v16 }
 0x23d   :  { %v885_v30 = vrot.slane %v879_v12, 5  ;;  %v1078_v41 = vld [vmem:[#allocation2 + $0x4] sm:$0x77]  ;;  %v825_v61 = vmul.f32 %v822_v26, %v806_v17  ;;  %v1326_v27 = vld [vmem:[#allocation2 + $0x14] sm:$0x77]  ;;  %v1015_v4 = vrot.slane %v2101_v31, 4 }
 0x23e   :  { %1083 = vst [vmem:[#allocation3 + $0x28] sm:$0x70] %v1078_v41  ;;  %v2139_v32 = vld [vmem:[#allocation2 + $0x14] sm:$0x77]  ;;  %v1080_v53 = vcombine.low %v1078_v41, %v1078_v41  ;;  %v2144_v37 = vmul.f32 %v1342_v28, %v1326_v27  ;;  %1088 = vst [vmem:[#allocation3 + $0x30] sm:$0x70] %v1086_v39  ;;  %v1306_v28 = vsel %vm80_vm4, %v1305_v49, %v2115_v47 }
 0x23f   :  { %834 = vrot.lane.b32.xlu0 %v826_v9, %s1666_s7  ;;  %910 = vrot.lane.b32.xlu1 %v905_v10, %s1667_s8  ;;  %v960_v33 = vld [vmem:[#allocation2 + $0x18] sm:$0x7]  ;;  %v1275_v43 = vrot.slane %v2139_v32, 3  ;;  %v959_v48 = vld [vmem:[#allocation2 + $0x10] sm:$0x77]  ;;  %v829_v18 = vcombine.high %v825_v61, %v825_v61  ;;  %v884_v24 = vrot.slane %v882_v63, 5  ;;  %v1016_v12 = vsel %vm265_vm8, %v1015_v4, %v2101_v31 }
 0x240   :  { %v979_v35 = vmul.f32 %v974_v34, %v960_v33  ;;  %v1040_v42 = vld [vmem:[#allocation2 + $0x18] sm:$0x7]  ;;  %1082 = vst [vmem:[#allocation3 + $0x20] sm:$0x70] %v1080_v53  ;;  %v1039_v50 = vld [vmem:[#allocation2 + $0x10] sm:$0x77]  ;;  %v2157_v6 = vmul.f32 %v975_v60, %v959_v48 }
 0x241   :  { %v1059_v25 = vmul.f32 %v1054_v46, %v1040_v42  ;;  %v2159_v57 = vmul.f32 %v1055_v54, %v1039_v50  ;;  %v1131_v7 = vld [vmem:[#allocation2 + $0x14] sm:$0x77]  ;;  %v919_v62 = vld [vmem:[#allocation2 + $0x8] sm:$0x7]  ;;  %v918_v3 = vld [vmem:[#allocation2] sm:$0x77] }
 0x242   :  { %v985_v44 = vrot.slane %v979_v35, 2  ;;  %v983_v58 = vrot.slane %v2157_v6, 2  ;;  %v2166_v5 = vmul.f32 %v2085_v14, %v1131_v7  ;;  %v938_v0 = vmul.f32 %v933_v19, %v919_v62  ;;  %v1001_v2 = vld [vmem:[#allocation2 + $0x8] sm:$0x7]  ;;  %v1000_v9 = vld [vmem:[#allocation2] sm:$0x77] }
 0x243   :  { %890 = vrot.lane.b32.xlu0 %v885_v30, %s1667_s8  ;;  %906 = vrot.lane.b32.xlu1 %v903_v15, %s1667_s8  ;;  %v1065_v56 = vrot.slane %v1059_v25, 7  ;;  %v1063_v59 = vrot.slane %v2159_v57, 7  ;;  %v934_v14 = vsel %vm181_vm7, %v933_v19, %v2088_v52  ;;  %v1020_v8 = vmul.f32 %v1015_v4, %v1001_v2  ;;  %v1090_v10 = vld [vmem:[#allocation2 + $0x4] sm:$0x77]  ;;  %v1211_v27 = vld [vmem:[#allocation2 + $0x14] sm:$0x77] }
 0x244   :  { %v1155_v23 = vrot.slane %v2166_v5, 1  ;;  %v944_v40 = vrot.slane %v938_v0, 2  ;;  %v937_v22 = vmul.f32 %v934_v14, %v918_v3  ;;  %v1019_v15 = vmul.f32 %v1016_v12, %v1000_v9  ;;  %v1250_v17 = vld [vmem:[#allocation2 + $0x4] sm:$0x77]  ;;  %v1379_v50 = vld [vmem:[%s2314_s4] sm:$0x7] }
 0x245   :  { %v1026_v13 = vrot.slane %v1020_v8, 7  ;;  %v1109_v16 = vmul.f32 %v2094_v29, %v1090_v10  ;;  %v1274_v52 = vcombine.high %v2139_v32, %v2139_v32  ;;  %v1254_v26 = vcombine.high %v1250_v17, %v1250_v17  ;;  %v1290_v33 = vld [vmem:[#allocation2 + $0x4] sm:$0x77] }
 0x246   :  { %v942_v30 = vrot.slane %v937_v22, 2  ;;  %v1024_v41 = vrot.slane %v1019_v15, 7  ;;  %v1227_v29 = vsel %vm199_vm10, %v1226_v11, %v2098_v21  ;;  %v1349_v32 = vcombine.high %v2144_v37, %v2144_v37  ;;  %v1172_v35 = vld [vmem:[#allocation2 + $0x4] sm:$0x77] }
 0x247   :  { %886 = vrot.lane.b32.xlu0 %v883_v1, %s1667_s8  ;;  %830 = vrot.lane.b32.xlu1 %v825_v61, %s1666_s7  ;;  %v1114_v20 = vrot.slane %v1109_v16, 1  ;;  %v1276_v31 = vrot.slane %v1274_v52, 3  ;;  %v1256_v1 = vrot.slane %v1254_v26, 3  ;;  %v941_v61 = vcombine.high %v937_v22, %v937_v22 }
 0x248   :  { %v1230_v53 = vmul.f32 %v1227_v29, %v1211_v27  ;;  %v1309_v39 = vmul.f32 %v1306_v28, %v1290_v33  ;;  %v1113_v11 = vcombine.high %v1109_v16, %v1109_v16  ;;  %v1191_v46 = vmul.f32 %v2113_v45, %v1172_v35 }
 0x249   :  { %v943_v34 = vrot.slane %v941_v61, 2  ;;  %v982_v38 = vcombine.high %v2157_v6, %v2157_v6  ;;  %v1255_v45 = vrot.slane %v1250_v17, 3  ;;  %v1062_v48 = vcombine.high %v2159_v57, %v2159_v57  ;;  %v2226_v57 = vpop.permute.xlu1 %1162 }
 0x24a   :  { %v1235_v42 = vrot.slane %v1230_v53, 6  ;;  %v1313_v47 = vcombine.high %v1309_v39, %v1309_v39  ;;  %v1115_v49 = vrot.slane %v1113_v11, 1  ;;  %v1154_v54 = vcombine.high %v2166_v5, %v2166_v5 }
 0x24b   :  { %1350 = vrot.lane.b32.xlu0 %v2144_v37, %s1664_s22  ;;  %1278 = vrot.lane.b32.xlu1 %v1275_v43, %s1668_s9  ;;  %v1023_v43 = vcombine.high %v1019_v15, %v1019_v15  ;;  %v1195_v37 = vcombine.high %v1191_v46, %v1191_v46  ;;  %v984_v25 = vrot.slane %v982_v38, 2  ;;  %v1064_v60 = vrot.slane %v1062_v48, 7 }
 0x24d   :  { %v1025_v21 = vrot.slane %v1023_v43, 7  ;;  %v2228_v7 = vpop.permute.xlu1 %1242 }
 0x24f   :  { %868 = vrot.lane.b32.xlu0 %v865_v36, %s1666_s7  ;;  %990 = vrot.lane.b32.xlu1 %v985_v44, %s1665_s30  ;;  %v1197_v36 = vrot.slane %v1195_v37, 6  ;;  %v1196_v44 = vrot.slane %v1191_v46, 6 }
 0x253   :  { %908 = vrot.lane.b32.xlu0 %v904_v55, %s1667_s8  ;;  %1070 = vrot.lane.b32.xlu1 %v1065_v56, %s1661_s15  ;;  %v1156_v55 = vrot.slane %v1154_v54, 1  ;;  %v1234_v56 = vcombine.high %v1230_v53, %v1230_v53 }
 0x255   :  { %v1236_v6 = vrot.slane %v1234_v56, 6 }
 0x257   :  { %986 = vrot.lane.b32.xlu0 %v983_v58, %s1665_s30  ;;  %1066 = vrot.lane.b32.xlu1 %v1063_v59, %s1661_s15  ;;  %v1640_v58 = vpop.permute.xlu1 %1639  ;;  %v2230_v59 = vpop.permute.xlu0 %1121 }
 0x258   :  { %v1641_v53 = vunpack.i.l.bf16 %v1640_v58 }
 0x25b   :  { %1158 = vrot.lane.b32.xlu0 %v1155_v23, %s1663_s21  ;;  %832 = vrot.lane.b32.xlu1 %v829_v18, %s1666_s7  ;;  %v1355_v5 = vpop.permute.xlu1 %1354  ;;  %v2232_v62 = vpop.permute.xlu0 %1203 }
 0x25f   :  { %949 = vrot.lane.b32.xlu0 %v944_v40, %s1665_s30  ;;  %888 = vrot.lane.b32.xlu1 %v884_v24, %s1667_s8  ;;  %v2234_v19 = vpop.permute.xlu1 %1318 }
 0x263   :  { %1031 = vrot.lane.b32.xlu0 %v1026_v13, %s1661_s15  ;;  %945 = vrot.lane.b32.xlu1 %v942_v30, %s1665_s30 }
 0x267   :  { %1027 = vrot.lane.b32.xlu0 %v1024_v41, %s1661_s15  ;;  %1117 = vrot.lane.b32.xlu1 %v1114_v20, %s1663_s21 }
 0x26b   :  { %1280 = vrot.lane.b32.xlu0 %v1276_v31, %s1668_s9  ;;  %1260 = vrot.lane.b32.xlu1 %v1256_v1, %s1668_s9 }
 0x26f   :  { %1352 = vrot.lane.b32.xlu0 %v1349_v32, %s1664_s22  ;;  %947 = vrot.lane.b32.xlu1 %v943_v34, %s1665_s30  ;;  %v1642_v34 = vunpack.i.h.bf16 %v1640_v58 }
 0x273   :  { %1238 = vrot.lane.b32.xlu0 %v1235_v42, %s1662_s16  ;;  %1029 = vrot.lane.b32.xlu1 %v1025_v21, %s1661_s15 }
 0x277   :  { %1119 = vrot.lane.b32.xlu1 %v1115_v49, %s1663_s21  ;;  %1316 = vrot.lane.b32.xlu0 %v1313_v47, %s1664_s22 }
 0x27b   :  { %1201 = vrot.lane.b32.xlu1 %v1197_v36, %s1662_s16  ;;  %1199 = vrot.lane.b32.xlu0 %v1196_v44, %s1662_s16 }
 0x27f   :  { %1258 = vrot.lane.b32.xlu1 %v1255_v45, %s1668_s9  ;;  %988 = vrot.lane.b32.xlu0 %v984_v25, %s1665_s30 }
 0x283   :  { %1382 = vperm.xlu1 %1637, %v1379_v50   ;;  %1068 = vrot.lane.b32.xlu0 %v1064_v60, %s1661_s15 }
 0x287   :  { %1160 = vrot.lane.b32.xlu0 %v1156_v55, %s1663_s21 }
 0x28b   :  { %1240 = vrot.lane.b32.xlu0 %v1236_v6, %s1662_s16 }
 0x28f   :  { %1314 = vrot.lane.b32.xlu0 %v1309_v39, %s1664_s22 }
 0x2ad   :  { %v867_v63 = vpop.permute.xlu0 %866  ;;  %v871_v18 = vpop.permute.xlu1 %870 }
 0x2b1   :  { %v835_v23 = vpop.permute.xlu0 %834  ;;  %v911_v0 = vpop.permute.xlu1 %910 }
 0x2b5   :  { %v891_v2 = vpop.permute.xlu0 %890  ;;  %v907_v3 = vpop.permute.xlu1 %906 }
 0x2b9   :  { %v887_v4 = vpop.permute.xlu0 %886  ;;  %v831_v14 = vpop.permute.xlu1 %830 }
 0x2bd   :  { %v1351_v24 = vpop.permute.xlu0 %1350  ;;  %v1279_v40 = vpop.permute.xlu1 %1278 }
 0x2c1   :  { %v869_v8 = vpop.permute.xlu0 %868  ;;  %v2236_v22 = vpop.permute.xlu1 %990 }
 0x2c2   :  { %v872_v9 = vsel %vm80_vm4, %v867_v63, %v869_v8  ;;  %v873_v10 = vsel %vm80_vm4, %v869_v8, %v871_v18 }
 0x2c3   :  { %876 = vst [vmem:[#allocation3 + $0x10] sm:$0x7] %v872_v9  ;;  %877 = vst [vmem:[#allocation3 + $0x18] sm:$0x7] %v873_v10 }
 0x2c5   :  { %v909_v12 = vpop.permute.xlu0 %908  ;;  %v2240_v13 = vpop.permute.xlu1 %1070 }
 0x2c6   :  { %v912_v30 = vsel %vm137_vm5, %v907_v3, %v909_v12  ;;  %v913_v15 = vsel %vm137_vm5, %v909_v12, %v911_v0 }
 0x2c7   :  { %916 = vst [vmem:[#allocation3 + $0x10] sm:$0x38] %v912_v30  ;;  %917 = vst [vmem:[#allocation3 + $0x18] sm:$0x38] %v913_v15 }
 0x2c9   :  { %v987_v16 = vpop.permute.xlu0 %986  ;;  %v2244_v17 = vpop.permute.xlu1 %1066 }
 0x2cd   :  { %v2246_v52 = vpop.permute.xlu0 %1158  ;;  %v833_v41 = vpop.permute.xlu1 %832 }
 0x2ce   :  { %v836_v20 = vsel %vm80_vm4, %v831_v14, %v833_v41  ;;  %v837_v26 = vsel %vm80_vm4, %v833_v41, %v835_v23 }
 0x2cf   :  { %840 = vst [vmem:[#allocation3] sm:$0x7] %v836_v20  ;;  %841 = vst [vmem:[#allocation3 + $0x8] sm:$0x7] %v837_v26 }
 0x2d1   :  { %v950_v31 = vpop.permute.xlu0 %949  ;;  %v889_v1 = vpop.permute.xlu1 %888 }
 0x2d2   :  { %v892_v61 = vsel %vm137_vm5, %v887_v4, %v889_v1  ;;  %v893_v27 = vsel %vm137_vm5, %v889_v1, %v891_v2 }
 0x2d3   :  { %896 = vst [vmem:[#allocation3] sm:$0x38] %v892_v61  ;;  %897 = vst [vmem:[#allocation3 + $0x8] sm:$0x38] %v893_v27 }
 0x2d5   :  { %v1032_v29 = vpop.permute.xlu0 %1031  ;;  %v946_v28 = vpop.permute.xlu1 %945 }
 0x2d9   :  { %v1028_v32 = vpop.permute.xlu0 %1027  ;;  %v1118_v33 = vpop.permute.xlu1 %1117 }
 0x2dd   :  { %v1281_v43 = vpop.permute.xlu0 %1280  ;;  %v1261_v35 = vpop.permute.xlu1 %1260 }
 0x2de   :  { %v1284_v39 = vsel %vm515_vm6, %v1279_v40, %v1281_v43  ;;  %v1285_v42 = vsel %vm515_vm6, %v1281_v43, %v1641_v53  ;;  %v1265_v21 = vsel %vm515_vm6, %v1261_v35, %v1642_v34  ;;  %v1362_v43 = vld [vmem:[%s2315_s3] sm:$0x7] }
 0x2df   :  { %1288 = vst [vmem:[#allocation3 + $0x50] sm:$0xe0] %v1284_v39  ;;  %1289 = vst [vmem:[#allocation3 + $0x58] sm:$0xe0] %v1285_v42 }
 0x2e0   :  { %1269 = vst [vmem:[#allocation3 + $0x48] sm:$0xe0] %v1265_v21 }
 0x2e1   :  { %v1353_v11 = vpop.permute.xlu0 %1352  ;;  %v948_v46 = vpop.permute.xlu1 %947 }
 0x2e2   :  { %v1356_v47 = vsel %vm65_vm3, %v1351_v24, %v1353_v11  ;;  %v1357_v49 = vsel %vm65_vm3, %v1353_v11, %v1355_v5  ;;  %v951_v37 = vsel %vm199_vm10, %v946_v28, %v948_v46  ;;  %v952_v36 = vsel %vm199_vm10, %v948_v46, %v950_v31 }
 0x2e3   :  { %1360 = vst [vmem:[#allocation3 + $0x70] sm:$0x7] %v1356_v47  ;;  %1361 = vst [vmem:[#allocation3 + $0x78] sm:$0x7] %v1357_v49 }
 0x2e4   :  { %955 = vst [vmem:[#allocation3 + $0x20] ss:$-28 sps:$4 sm:$0xc1] %v951_v37   ;;  %956 = vst [vmem:[#allocation3 + $0x28] ss:$-28 sps:$4 sm:$0xc1] %v952_v36  }
 0x2e5   :  { %v1239_v44 = vpop.permute.xlu0 %1238  ;;  %v1030_v38 = vpop.permute.xlu1 %1029 }
 0x2e6   :  { %v1033_v45 = vsel %vm283_vm9, %v1028_v32, %v1030_v38  ;;  %v1034_v25 = vsel %vm283_vm9, %v1030_v38, %v1032_v29 }
 0x2e7   :  { %1037 = vst [vmem:[#allocation3 + $0x20] sm:$0xe] %v1033_v45  ;;  %1038 = vst [vmem:[#allocation3 + $0x28] sm:$0xe] %v1034_v25 }
 0x2e9   :  { %v1317_v48 = vpop.permute.xlu0 %1316  ;;  %v1120_v50 = vpop.permute.xlu1 %1119 }
 0x2ea   :  { %v1321_v60 = vsel %vm65_vm3, %v1317_v48, %v2234_v19  ;;  %v1123_v54 = vsel %vm265_vm8, %v1118_v33, %v1120_v50  ;;  %v1124_v55 = vsel %vm265_vm8, %v1120_v50, %v2230_v59  ;;  %v1378_v27 = vld [vmem:[#allocation3 + $0x78] sm:$0x7]  ;;  %v1377_v32 = vld [vmem:[#allocation3 + $0x70] sm:$0x7] }
 0x2eb   :  { %1325 = vst [vmem:[#allocation3 + $0x68] sm:$0x7] %v1321_v60  ;;  %1127 = vst [vmem:[#allocation3 + $0x40] ss:$-28 sps:$4 sm:$0x83] %v1123_v54   ;;  %v1364_v19 = vld [vmem:[#allocation3 + $0x8] sm:$0xff] }
 0x2ec   :  { %1128 = vst [vmem:[#allocation3 + $0x48] ss:$-28 sps:$4 sm:$0x83] %v1124_v55   ;;  %v1363_v3 = vld [vmem:[#allocation3] sm:$0xff] }
 0x2ed   :  { %v1200_v56 = vpop.permute.xlu0 %1199  ;;  %v1202_v6 = vpop.permute.xlu1 %1201 }
 0x2ee   :  { %v1205_v58 = vsel %vm181_vm7, %v1200_v56, %v1202_v6  ;;  %v1206_v5 = vsel %vm181_vm7, %v1202_v6, %v2232_v62 }
 0x2ef   :  { %1209 = vst [vmem:[#allocation3 + $0x40] sm:$0x1c] %v1205_v58  ;;  %1210 = vst [vmem:[#allocation3 + $0x48] sm:$0x1c] %v1206_v5 }
 0x2f1   :  { %v989_v63 = vpop.permute.xlu0 %988  ;;  %v1259_v18 = vpop.permute.xlu1 %1258 }
 0x2f2   :  { %v992_v23 = vsel %vm199_vm10, %v987_v16, %v989_v63  ;;  %v993_v59 = vsel %vm199_vm10, %v989_v63, %v2236_v22  ;;  %v1264_v0 = vsel %vm515_vm6, %v1259_v18, %v1261_v35  ;;  %v1367_v4 = vld [vmem:[#allocation3 + $0x20] sm:$0xff]  ;;  %v1376_v9 = vld [vmem:[#allocation3 + $0x68] sm:$0x7] }
 0x2f3   :  { %v1368_v2 = vld [vmem:[#allocation3 + $0x28] sm:$0xff]  ;;  %996 = vst [vmem:[#allocation3 + $0x30] ss:$-28 sps:$4 sm:$0xc1] %v992_v23   ;;  %1268 = vst [vmem:[#allocation3 + $0x40] sm:$0xe0] %v1264_v0  ;;  %v1603_v62 = vpack.c.bf16 %v1367_v4, %v1363_v3 }
 0x2f4   :  { %997 = vst [vmem:[#allocation3 + $0x38] ss:$-28 sps:$4 sm:$0xc1] %v993_v59   ;;  %v1601_v14 = vpack.c.bf16 %v1368_v2, %v1364_v19 }
 0x2f5   :  { %v1069_v24 = vpop.permute.xlu0 %1068 }
 0x2f6   :  { %1602 = vmatprep.subr.bf16.mxu0 %v1601_v14  ;;  %v1072_v40 = vsel %vm283_vm9, %v2244_v17, %v1069_v24  ;;  %v1073_v8 = vsel %vm283_vm9, %v1069_v24, %v2240_v13  ;;  %v1372_v22 = vld [vmem:[#allocation3 + $0x48] sm:$0xff] }
 0x2f7   :  { %1604 = vmatpush1.bf16.msra.mxu0 %v1603_v62  ;;  %1076 = vst [vmem:[#allocation3 + $0x30] sm:$0xe] %v1072_v40  ;;  %1077 = vst [vmem:[#allocation3 + $0x38] sm:$0xe] %v1073_v8  ;;  %v1605_v10 = vpack.c.bf16 %v1376_v9, %v1372_v22 }
 0x2f9   :  { %v1161_v12 = vpop.permute.xlu0 %1160  ;;  %1607 = vmatprep.subr.msk.bf16.mxu0 %vm2062_vm13, %v1605_v10 }
 0x2fa   :  { %v1164_v30 = vsel %vm265_vm8, %v2246_v52, %v1161_v12  ;;  %v1165_v15 = vsel %vm265_vm8, %v1161_v12, %v2226_v57  ;;  %v1365_v1 = vld [vmem:[#allocation3 + $0x10] sm:$0xff]  ;;  %v1371_v34 = vld [vmem:[#allocation3 + $0x40] sm:$0xff] }
 0x2fb   :  { %1168 = vst [vmem:[#allocation3 + $0x50] ss:$-28 sps:$4 sm:$0x83] %v1164_v30   ;;  %1169 = vst [vmem:[#allocation3 + $0x58] ss:$-28 sps:$4 sm:$0x83] %v1165_v15  }
 0x2fc   :  { %v1366_v20 = vld [vmem:[#allocation3 + $0x18] sm:$0xff] }
 0x2fd   :  { %v1241_v16 = vpop.permute.xlu0 %1240 }
 0x2fe   :  { %v1244_v13 = vsel %vm181_vm7, %v1239_v44, %v1241_v16  ;;  %v1245_v17 = vsel %vm181_vm7, %v1241_v16, %v2228_v7 }
 0x2ff   :  { %1248 = vst [vmem:[#allocation3 + $0x50] sm:$0x1c] %v1244_v13  ;;  %1249 = vst [vmem:[#allocation3 + $0x58] sm:$0x1c] %v1245_v17 }
 0x301   :  { %v1315_v41 = vpop.permute.xlu0 %1314 }
 0x302   :  { %v1320_v26 = vsel %vm65_vm3, %v1315_v41, %v1317_v48  ;;  %v1370_v31 = vld [vmem:[#allocation3 + $0x38] sm:$0xff]  ;;  %v1369_v52 = vld [vmem:[#allocation3 + $0x30] sm:$0xff]  ;;  %v1383_v39 = vpop.permute.xlu1 %1382 }
 0x303   :  { %1324 = vst [vmem:[#allocation3 + $0x60] sm:$0x7] %v1320_v26  ;;  %v1611_v61 = vpack.c.bf16 %v1370_v31, %v1366_v20  ;;  %v1613_v57 = vpack.c.bf16 %v1369_v52, %v1365_v1 }
 0x305   :  { %1612 = vmatprep.subr.bf16.mxu1 %v1611_v61 }
 0x306   :  { %1614 = vmatpush1.bf16.msra.mxu1 %v1613_v57  ;;  %v1374_v29 = vld [vmem:[#allocation3 + $0x58] sm:$0xff]  ;;  %v1373_v28 = vld [vmem:[#allocation3 + $0x50] sm:$0xff] }
 0x307   :  { %v1615_v33 = vpack.c.bf16 %v1378_v27, %v1374_v29  ;;  %v1618_v7 = vpack.c.bf16 %v1377_v32, %v1373_v28 }
 0x309   :  { %1617 = vmatprep.subr.msk.bf16.mxu1 %vm2062_vm13, %v1615_v33 }
 0x30a   :  { %1620 = vmatpush1.bf16.msk.msra.mxu1 %vm2062_vm13, %v1618_v7  ;;  %v1375_v53 = vld [vmem:[#allocation3 + $0x60] sm:$0x7] }
 0x30b   :  { %v1608_v35 = vpack.c.bf16 %v1375_v53, %v1371_v34 }
 0x30d   :  { %1610 = vmatpush1.bf16.msk.msra.mxu0 %vm2062_vm13, %v1608_v35  ;;  %1580 = vmatmul.mubr.msk.f32.vlgmr.msra.gmra.mrb[2].mxu1 %vm637_vm14, %v1362_v43 }
 0x310   :  { %1577 = vmatmul.mubr.msk.f32.vlgmr.msra.gmra.mrb[2].mxu0 %vm637_vm14, %v1362_v43 }
 0x3e0   :  { %v1537_v42 = vpop.f32.mrb[2].mxu1 }
 0x3e1   :  { %v1538_v21 = vadd.f32 %v1537_v42, %v1383_v39  ;;  %v1539_v11 = vpop.f32.mrb[3].mxu1 }
 0x3e2   :  { %v1540_v46 = vadd.f32 %v1539_v11, %v1383_v39 }
 0x3e3   :  { %v1546_v47 = vrot.slane %v1538_v21, 5  ;;  %v1466_v49 = vpop.f32.mrb[2].mxu0 }
 0x3e4   :  { %v1547_v37 = vrot.slane %v1540_v46, 5  ;;  %v1467_v36 = vadd.f32 %v1466_v49, %v1383_v39  ;;  %v1468_v44 = vpop.f32.mrb[3].mxu0 }
 0x3e5   :  { %1550 = vst [vmem:[%s2316_s6] sm:$0x38] %v1546_v47  ;;  %v1469_v51 = vadd.f32 %v1468_v44, %v1383_v39 }
 0x3e6   :  { %1551 = vst [vmem:[%s2316_s6 + $0x8] sm:$0x38] %v1547_v37  ;;  %1542 = vst [vmem:[%s2316_s6] sm:$0x7] %v1467_v36 }
 0x3e7   :  { %1543 = vst [vmem:[%s2316_s6 + $0x8] sm:$0x7] %v1469_v51 }

</bundles_post_ra>
